<compile_context>
chip_gen: v7x
topology: tpu7x:2x2x1
jax: 0.10.0
libtpu: 0.0.40
codegen_flags: <defaults>
</compile_context>

<pallas_src>
import jax
import jax.numpy as jnp
from jax.experimental import pallas as pl
from jax.experimental.pallas import tpu as pltpu


def encoder_head_kernel(x_ref, wt_ref, o_ref):
    # x_ref:  (TB, C, HW)  NCHW feature block with spatial flattened on lanes
    # wt_ref: (D_out, C)   projection matrix, pre-transposed (lane-dense)
    # o_ref:  (TB, D_out)
    hw = x_ref.shape[-1]                                   # static
    x = x_ref[...].astype(jnp.float32)                     # (TB, C, HW)

    # AdaptiveAvgPool2d(1): sum over the spatial (lane) axis; the 1/HW mean
    # scale is folded in after the projection (one tiny scalar multiply on the
    # (TB, D_out) result instead of on the full (TB, C, HW) block).
    pooled = jnp.sum(x, axis=-1)                           # (TB, C)

    wt = wt_ref[...].astype(jnp.float32)                   # (D_out, C)
    # torch.mm(pooled_mean, W) == contraction of C against the rows of W^T.
    out = jax.lax.dot_general(
        pooled, wt,
        dimension_numbers=(((1,), (1,)), ((), ())),
        preferred_element_type=jnp.float32)                # (TB, D_out)

    o_ref[...] = (out * (1.0 / hw)).astype(o_ref.dtype)


def encoder_head(feat_nchw, W, *, vmem_budget_bytes=16 * 1024 * 1024):
    """AdaptiveAvgPool2d(1) + squeeze + mm(W) on a (B, C, H, W) feature map."""
    B, C, H, Wd = feat_nchw.shape
    HW = H * Wd
    D_out = W.shape[1]

    # Free, stride-preserving reshape — no HBM transpose before the kernel.
    x = feat_nchw.reshape(B, C, HW)
    # Lane-dense weight: (C, D_out) -> (D_out, C); tiny one-time transform.
    wt = jnp.transpose(W)

    # Batch-tile: largest divisor of B whose double-buffered input block fits
    # the scoped-VMEM budget (conservative for v7x's 64 MiB VMEM).  MobileViT
    # feature maps are tiny (960 x 8 x 8 ~= 240 KB f32 / element), so this is
    # usually the whole batch or a large chunk of it.
    bytes_per_elem = C * HW * x.dtype.itemsize
    tb_budget = max(1, vmem_budget_bytes // (2 * bytes_per_elem))
    TB = 1
    for d in range(1, B + 1):
        if B % d == 0 and d <= tb_budget:
            TB = d
    grid = (B // TB,)

    out = pl.pallas_call(
        encoder_head_kernel,
        out_shape=jax.ShapeDtypeStruct((B, D_out), jnp.float32),
        grid_spec=pltpu.PrefetchScalarGridSpec(
            num_scalar_prefetch=0,
            grid=grid,
            in_specs=[
                pl.BlockSpec((TB, C, HW), lambda b: (b, 0, 0)),
                pl.BlockSpec((D_out, C), lambda b: (0, 0)),
            ],
            out_specs=pl.BlockSpec((TB, D_out), lambda b: (b, 0)),
        ),
        compiler_params=pltpu.CompilerParams(
            dimension_semantics=("parallel",)),
    )(x, wt)

    # matches torch: x.squeeze() -> (B, 960); mm -> (B, 4)
    # (intentional divergence: B=1 stays 2-D here instead of collapsing,
    #  since torch.mm would reject the 1-D squeeze anyway)
    return out


def make_params(key):
    # W: (960, 4), xavier_normal_ with gain=1 -> std = sqrt(2 / (fan_in + fan_out))
    fan_in, fan_out = 960, 4
    std = (2.0 / (fan_in + fan_out)) ** 0.5
    W = std * jax.random.normal(key, (fan_in, fan_out), dtype=jnp.float32)
    return W


if __name__ == "__main__":
    key = jax.random.PRNGKey(0)
    k_feat, k_w = jax.random.split(key)

    # Stand-in for mobileVit(img) pre-pool feature map: (B, 960, 8, 8).
    B, C, H, Wd = 2, 960, 8, 8
    feat = jax.random.normal(k_feat, (B, C, H, Wd), dtype=jnp.float32)
    W = make_params(k_w)

    out = encoder_head(feat, W)
    out = jax.block_until_ready(out)

    # Pure-JAX reference of the same head for a sanity check.
    ref = jnp.mean(feat, axis=(2, 3)) @ W           # (B, 4)
    assert out.shape == (B, 4)
    assert jnp.allclose(out, ref, atol=1e-4, rtol=1e-4)

    print("KERNEL_OK")
</pallas_src>

<mosaic_0001>
module attributes {stable_mosaic.version = 11 : i64} {
  func.func @encoder_head_kernel(%arg0: i32, %arg1: memref<2x960x64xf32, #tpu.memory_space<vmem>>, %arg2: memref<4x960xf32, #tpu.memory_space<vmem>>, %arg3: memref<2x4xf32, #tpu.memory_space<vmem>>) attributes {dimension_semantics = [#tpu.dimension_semantics<parallel>], iteration_bounds = array<i64: 1>, scalar_prefetch = 0 : i64, scratch_operands = 0 : i64, tpu.core_type = #tpu.core_type<tc>, window_params = [{transform_indices = @transform_0, window_bounds = array<i64: 2, 960, 64>}, {pipeline_mode = #tpu.pipeline_mode<synchronous>, transform_indices = @transform_1, window_bounds = array<i64: 4, 960>}, {transform_indices = @transform_2, window_bounds = array<i64: 2, 4>}]} {
    %c0 = arith.constant 0 : index
    %c0_0 = arith.constant 0 : index
    %c0_1 = arith.constant 0 : index
    %0 = vector.load %arg1[%c0, %c0_0, %c0_1] : memref<2x960x64xf32, #tpu.memory_space<vmem>>, vector<2x960x64xf32>
    %cst = arith.constant dense<0.000000e+00> : vector<2x960xf32>
    %1 = vector.multi_reduction <add>, %0, %cst [2] : vector<2x960x64xf32> to vector<2x960xf32>
    %c0_2 = arith.constant 0 : index
    %c0_3 = arith.constant 0 : index
    %2 = vector.load %arg2[%c0_2, %c0_3] : memref<4x960xf32, #tpu.memory_space<vmem>>, vector<4x960xf32>
    %cst_4 = arith.constant dense<0.000000e+00> : vector<2x4xf32>
    %3 = tpu.matmul %1, %2, %cst_4 {dimension_numbers = #tpu.dot_dimension_numbers<[1], [1], [0], [0], [0, 0, 1, 0], [], []>} : vector<2x960xf32>, vector<4x960xf32>, vector<2x4xf32> -> vector<2x4xf32>
    %cst_5 = arith.constant 1.562500e-02 : f32
    %4 = vector.broadcast %cst_5 : f32 to vector<2x4xf32>
    %5 = arith.mulf %3, %4 : vector<2x4xf32>
    %c0_6 = arith.constant 0 : index
    %c0_7 = arith.constant 0 : index
    %6 = vector.load %arg3[%c0_6, %c0_7] : memref<2x4xf32, #tpu.memory_space<vmem>>, vector<2x4xf32>
    tpu.vector_store %arg3[%c0_6, %c0_7], %5 {strides = array<i32>} : memref<2x4xf32, #tpu.memory_space<vmem>>, vector<2x4xf32>,
    return
  }
  func.func @transform_0(%arg0: i32) -> (i32, i32, i32) {
    %c0_i32 = arith.constant 0 : i32
    %c0_i32_0 = arith.constant 0 : i32
    %c0_i32_1 = arith.constant 0 : i32
    return %arg0, %c0_i32, %c0_i32_0 : i32, i32, i32
  }
  func.func @transform_1(%arg0: i32) -> (i32, i32) {
    %c0_i32 = arith.constant 0 : i32
    %c0_i32_0 = arith.constant 0 : i32
    %c0_i32_1 = arith.constant 0 : i32
    return %c0_i32, %c0_i32_0 : i32, i32
  }
  func.func @transform_2(%arg0: i32) -> (i32, i32) {
    %c0_i32 = arith.constant 0 : i32
    %c0_i32_0 = arith.constant 0 : i32
    return %arg0, %c0_i32 : i32, i32
  }
}

</mosaic_0001>

<bundles_post_ra>
// kernel: tpu_custom_call.1
= control target key start
LH: loop header
LB: loop body
LE: loop exit
PB: predicated region body
PF: predicated region fallthrough
CT: control target
= control target key end

     0   :  { %vm4445_vm0 = vcmask 523264   ;;  %s4442_s0 = inlined_call_operand.vmem [shape: f32[2,960,64], index: 0, kind: input, shape index: {}]   ;;  %s4443_s1 = inlined_call_operand.vmem [shape: f32[4,960], index: 1, kind: input, shape index: {}]   ;;  %s4444_s2 = inlined_call_operand.hbm [shape: f32[2,4], index: 2, kind: output, shape index: {}]  }
   0x1   :  { %v14_v0 = vld [vmem:[%s4442_s0 + $0x10] sm:$0xff]  ;;  %v12_v1 = vld [vmem:[%s4442_s0] sm:$0xff]  ;;  %v15_v2 = vld [vmem:[%s4442_s0 + $0x18] sm:$0xff] }
   0x2   :  { %v259_v3 = vsel %vm4445_vm0, %v14_v0, 0.0  ;;  %v253_v4 = vsel %vm4445_vm0, %v12_v1, 0.0  ;;  %v13_v5 = vld [vmem:[%s4442_s0 + $0x8] sm:$0xff]  ;;  %v262_v6 = vsel %vm4445_vm0, %v15_v2, 0.0  ;;  %v16_v9 = vld [vmem:[%s4442_s0 + $0x20] sm:$0xff]  ;;  %v19_v12 = vld [vmem:[%s4442_s0 + $0x38] sm:$0xff] }
   0x3   :  { %260 = vadd.xlane.f32.xlu1 %v259_v3  ;;  %254 = vadd.xlane.f32.xlu0 %v253_v4  ;;  %v256_v7 = vsel %vm4445_vm0, %v13_v5, 0.0  ;;  %v17_v8 = vld [vmem:[%s4442_s0 + $0x28] sm:$0xff]  ;;  %v265_v11 = vsel %vm4445_vm0, %v16_v9, 0.0  ;;  %v18_v13 = vld [vmem:[%s4442_s0 + $0x30] sm:$0xff]  ;;  %v274_v14 = vsel %vm4445_vm0, %v19_v12, 0.0  ;;  %v20_v17 = vld [vmem:[%s4442_s0 + $0x40] sm:$0xff] }
   0x4   :  { %v268_v10 = vsel %vm4445_vm0, %v17_v8, 0.0  ;;  %v271_v15 = vsel %vm4445_vm0, %v18_v13, 0.0  ;;  %v21_v16 = vld [vmem:[%s4442_s0 + $0x48] sm:$0xff]  ;;  %v277_v19 = vsel %vm4445_vm0, %v20_v17, 0.0  ;;  %v23_v20 = vld [vmem:[%s4442_s0 + $0x58] sm:$0xff]  ;;  %v22_v21 = vld [vmem:[%s4442_s0 + $0x50] sm:$0xff] }
   0x5   :  { %v280_v18 = vsel %vm4445_vm0, %v21_v16, 0.0  ;;  %v286_v22 = vsel %vm4445_vm0, %v23_v20, 0.0  ;;  %v283_v23 = vsel %vm4445_vm0, %v22_v21, 0.0  ;;  %v25_v24 = vld [vmem:[%s4442_s0 + $0x68] sm:$0xff]  ;;  %v24_v25 = vld [vmem:[%s4442_s0 + $0x60] sm:$0xff]  ;;  %v27_v28 = vld [vmem:[%s4442_s0 + $0x78] sm:$0xff] }
   0x6   :  { %v292_v26 = vsel %vm4445_vm0, %v25_v24, 0.0  ;;  %v289_v27 = vsel %vm4445_vm0, %v24_v25, 0.0  ;;  %v26_v29 = vld [vmem:[%s4442_s0 + $0x70] sm:$0xff]  ;;  %v298_v30 = vsel %vm4445_vm0, %v27_v28, 0.0 }
   0x7   :  { %263 = vadd.xlane.f32.xlu1 %v262_v6  ;;  %257 = vadd.xlane.f32.xlu0 %v256_v7  ;;  %v295_v31 = vsel %vm4445_vm0, %v26_v29, 0.0 }
   0xb   :  { %269 = vadd.xlane.f32.xlu1 %v268_v10  ;;  %266 = vadd.xlane.f32.xlu0 %v265_v11 }
   0xf   :  { %275 = vadd.xlane.f32.xlu1 %v274_v14  ;;  %272 = vadd.xlane.f32.xlu0 %v271_v15 }
  0x13   :  { %281 = vadd.xlane.f32.xlu1 %v280_v18  ;;  %278 = vadd.xlane.f32.xlu0 %v277_v19 }
  0x17   :  { %287 = vadd.xlane.f32.xlu1 %v286_v22  ;;  %284 = vadd.xlane.f32.xlu0 %v283_v23 }
  0x1b   :  { %293 = vadd.xlane.f32.xlu1 %v292_v26  ;;  %290 = vadd.xlane.f32.xlu0 %v289_v27 }
  0x1c   :  { %7 = vsyncpa [#allocation3], 0  ;;  %v29_v32 = vld [vmem:[%s4442_s0 + $0x88] sm:$0xff]  ;;  %v28_v33 = vld [vmem:[%s4442_s0 + $0x80] sm:$0xff]  ;;  %vm1228_vm1 = vcmask 130112   ;;  %vm1235_vm2 = vcmask 195712  }
  0x1d   :  { %v304_v34 = vsel %vm4445_vm0, %v29_v32, 0.0  ;;  %v301_v35 = vsel %vm4445_vm0, %v28_v33, 0.0  ;;  %v31_v36 = vld [vmem:[%s4442_s0 + $0x98] sm:$0xff]  ;;  %v30_v37 = vld [vmem:[%s4442_s0 + $0x90] sm:$0xff]  ;;  %v33_v40 = vld [vmem:[%s4442_s0 + $0xa8] sm:$0xff]  ;;  %vm1242_vm3 = vcmask 261312  }
  0x1e   :  { %v310_v38 = vsel %vm4445_vm0, %v31_v36, 0.0  ;;  %v307_v39 = vsel %vm4445_vm0, %v30_v37, 0.0  ;;  %v32_v41 = vld [vmem:[%s4442_s0 + $0xa0] sm:$0xff]  ;;  %v316_v42 = vsel %vm4445_vm0, %v33_v40, 0.0  ;;  %v35_v44 = vld [vmem:[%s4442_s0 + $0xb8] sm:$0xff]  ;;  %v34_v45 = vld [vmem:[%s4442_s0 + $0xb0] sm:$0xff] }
  0x1f   :  { %299 = vadd.xlane.f32.xlu1 %v298_v30  ;;  %296 = vadd.xlane.f32.xlu0 %v295_v31  ;;  %v313_v43 = vsel %vm4445_vm0, %v32_v41, 0.0  ;;  %v322_v46 = vsel %vm4445_vm0, %v35_v44, 0.0  ;;  %v319_v47 = vsel %vm4445_vm0, %v34_v45, 0.0  ;;  %v37_v48 = vld [vmem:[%s4442_s0 + $0xc8] sm:$0xff]  ;;  %v36_v49 = vld [vmem:[%s4442_s0 + $0xc0] sm:$0xff]  ;;  %v39_v52 = vld [vmem:[%s4442_s0 + $0xd8] sm:$0xff] }
  0x20   :  { %v328_v50 = vsel %vm4445_vm0, %v37_v48, 0.0  ;;  %v325_v51 = vsel %vm4445_vm0, %v36_v49, 0.0  ;;  %v38_v53 = vld [vmem:[%s4442_s0 + $0xd0] sm:$0xff]  ;;  %v334_v54 = vsel %vm4445_vm0, %v39_v52, 0.0  ;;  %v41_v56 = vld [vmem:[%s4442_s0 + $0xe8] sm:$0xff]  ;;  %v40_v57 = vld [vmem:[%s4442_s0 + $0xe0] sm:$0xff] }
  0x21   :  { %v331_v55 = vsel %vm4445_vm0, %v38_v53, 0.0  ;;  %v340_v58 = vsel %vm4445_vm0, %v41_v56, 0.0  ;;  %v337_v59 = vsel %vm4445_vm0, %v40_v57, 0.0  ;;  %v43_v60 = vld [vmem:[%s4442_s0 + $0xf8] sm:$0xff]  ;;  %v42_v61 = vld [vmem:[%s4442_s0 + $0xf0] sm:$0xff]  ;;  %v45_v0 = vld [vmem:[%s4442_s0 + $0x108] sm:$0xff] }
  0x22   :  { %v346_v62 = vsel %vm4445_vm0, %v43_v60, 0.0  ;;  %v343_v63 = vsel %vm4445_vm0, %v42_v61, 0.0  ;;  %v44_v1 = vld [vmem:[%s4442_s0 + $0x100] sm:$0xff]  ;;  %v352_v2 = vsel %vm4445_vm0, %v45_v0, 0.0  ;;  %v47_v4 = vld [vmem:[%s4442_s0 + $0x118] sm:$0xff]  ;;  %v46_v5 = vld [vmem:[%s4442_s0 + $0x110] sm:$0xff] }
  0x23   :  { %305 = vadd.xlane.f32.xlu1 %v304_v34  ;;  %302 = vadd.xlane.f32.xlu0 %v301_v35  ;;  %v349_v3 = vsel %vm4445_vm0, %v44_v1, 0.0  ;;  %v358_v6 = vsel %vm4445_vm0, %v47_v4, 0.0  ;;  %v355_v7 = vsel %vm4445_vm0, %v46_v5, 0.0  ;;  %v49_v8 = vld [vmem:[%s4442_s0 + $0x128] sm:$0xff]  ;;  %v48_v9 = vld [vmem:[%s4442_s0 + $0x120] sm:$0xff]  ;;  %v51_v12 = vld [vmem:[%s4442_s0 + $0x138] sm:$0xff] }
  0x24   :  { %v364_v10 = vsel %vm4445_vm0, %v49_v8, 0.0  ;;  %v361_v11 = vsel %vm4445_vm0, %v48_v9, 0.0  ;;  %v50_v13 = vld [vmem:[%s4442_s0 + $0x130] sm:$0xff]  ;;  %v370_v14 = vsel %vm4445_vm0, %v51_v12, 0.0  ;;  %v53_v16 = vld [vmem:[%s4442_s0 + $0x148] sm:$0xff]  ;;  %v52_v17 = vld [vmem:[%s4442_s0 + $0x140] sm:$0xff] }
  0x25   :  { %v367_v15 = vsel %vm4445_vm0, %v50_v13, 0.0  ;;  %v376_v18 = vsel %vm4445_vm0, %v53_v16, 0.0  ;;  %v373_v19 = vsel %vm4445_vm0, %v52_v17, 0.0  ;;  %v55_v20 = vld [vmem:[%s4442_s0 + $0x158] sm:$0xff]  ;;  %v54_v21 = vld [vmem:[%s4442_s0 + $0x150] sm:$0xff]  ;;  %v57_v24 = vld [vmem:[%s4442_s0 + $0x168] sm:$0xff] }
  0x26   :  { %v382_v22 = vsel %vm4445_vm0, %v55_v20, 0.0  ;;  %v379_v23 = vsel %vm4445_vm0, %v54_v21, 0.0  ;;  %v56_v25 = vld [vmem:[%s4442_s0 + $0x160] sm:$0xff]  ;;  %v388_v26 = vsel %vm4445_vm0, %v57_v24, 0.0  ;;  %v59_v28 = vld [vmem:[%s4442_s0 + $0x178] sm:$0xff]  ;;  %v58_v29 = vld [vmem:[%s4442_s0 + $0x170] sm:$0xff] }
  0x27   :  { %311 = vadd.xlane.f32.xlu1 %v310_v38  ;;  %308 = vadd.xlane.f32.xlu0 %v307_v39  ;;  %v385_v27 = vsel %vm4445_vm0, %v56_v25, 0.0  ;;  %v394_v30 = vsel %vm4445_vm0, %v59_v28, 0.0  ;;  %v391_v31 = vsel %vm4445_vm0, %v58_v29, 0.0  ;;  %v61_v32 = vld [vmem:[%s4442_s0 + $0x188] sm:$0xff]  ;;  %v60_v33 = vld [vmem:[%s4442_s0 + $0x180] sm:$0xff]  ;;  %v63_v36 = vld [vmem:[%s4442_s0 + $0x198] sm:$0xff] }
  0x28   :  { %v400_v34 = vsel %vm4445_vm0, %v61_v32, 0.0  ;;  %v397_v35 = vsel %vm4445_vm0, %v60_v33, 0.0  ;;  %v62_v37 = vld [vmem:[%s4442_s0 + $0x190] sm:$0xff]  ;;  %v406_v38 = vsel %vm4445_vm0, %v63_v36, 0.0  ;;  %v65_v40 = vld [vmem:[%s4442_s0 + $0x1a8] sm:$0xff]  ;;  %v64_v41 = vld [vmem:[%s4442_s0 + $0x1a0] sm:$0xff] }
  0x29   :  { %v403_v39 = vsel %vm4445_vm0, %v62_v37, 0.0  ;;  %v67_v44 = vld [vmem:[%s4442_s0 + $0x1b8] sm:$0xff]  ;;  %v66_v45 = vld [vmem:[%s4442_s0 + $0x1b0] sm:$0xff]  ;;  %v69_v48 = vld [vmem:[%s4442_s0 + $0x1c8] sm:$0xff]  ;;  %vm1249_vm4 = vcmask 326912   ;;  %vm1256_vm5 = vcmask 392512  }
  0x2a   :  { %v68_v49 = vld [vmem:[%s4442_s0 + $0x1c0] sm:$0xff]  ;;  %v71_v52 = vld [vmem:[%s4442_s0 + $0x1d8] sm:$0xff]  ;;  %v70_v53 = vld [vmem:[%s4442_s0 + $0x1d0] sm:$0xff]  ;;  %vm1263_vm6 = vcmask 458112   ;;  %vm1270_vm7 = vcmask 523712   ;;  %vm1277_vm8 = vcmask 589312  }
  0x2b   :  { %317 = vadd.xlane.f32.xlu1 %v316_v42  ;;  %314 = vadd.xlane.f32.xlu0 %v313_v43  ;;  %v412_v42 = vsel %vm4445_vm0, %v65_v40, 0.0  ;;  %v409_v43 = vsel %vm4445_vm0, %v64_v41, 0.0  ;;  %v73_v56 = vld [vmem:[%s4442_s0 + $0x1e8] sm:$0xff]  ;;  %v72_v57 = vld [vmem:[%s4442_s0 + $0x1e0] sm:$0xff]  ;;  %v75_v60 = vld [vmem:[%s4442_s0 + $0x1f8] sm:$0xff]  ;;  %vm1284_vm9 = vcmask 654912  }
  0x2c   :  { %v74_v61 = vld [vmem:[%s4442_s0 + $0x1f0] sm:$0xff]  ;;  %v77_v0 = vld [vmem:[%s4442_s0 + $0x208] sm:$0xff]  ;;  %v76_v1 = vld [vmem:[%s4442_s0 + $0x200] sm:$0xff]  ;;  %vm1291_vm10 = vcmask 720512   ;;  %vm1298_vm11 = vcmask 786112   ;;  %vm1305_vm12 = vcmask 851712  }
  0x2d   :  { %v79_v4 = vld [vmem:[%s4442_s0 + $0x218] sm:$0xff]  ;;  %v78_v5 = vld [vmem:[%s4442_s0 + $0x210] sm:$0xff]  ;;  %v81_v8 = vld [vmem:[%s4442_s0 + $0x228] sm:$0xff]  ;;  %vm1312_vm13 = vcmask 917312   ;;  %vm1319_vm14 = vcmask 982912   ;;  %vm1326_vm15 = vcmask 1048512  }
  0x2e   :  { %v80_v9 = vld [vmem:[%s4442_s0 + $0x220] sm:$0xff]  ;;  %v83_v13 = vld [vmem:[%s4442_s0 + $0x238] sm:$0xff]  ;;  %v89_v36 = vld [vmem:[%s4442_s0 + $0x268] sm:$0xff] }
  0x2f   :  { %323 = vadd.xlane.f32.xlu1 %v322_v46  ;;  %320 = vadd.xlane.f32.xlu0 %v319_v47  ;;  %v418_v46 = vsel %vm4445_vm0, %v67_v44, 0.0  ;;  %v415_v47 = vsel %vm4445_vm0, %v66_v45, 0.0  ;;  %v457_v12 = vsel %vm4445_vm0, %v80_v9, 0.0  ;;  %v466_v16 = vsel %vm4445_vm0, %v83_v13, 0.0  ;;  %v84_v20 = vld [vmem:[%s4442_s0 + $0x240] sm:$0xff] }
  0x30   :  { %v88_v41 = vld [vmem:[%s4442_s0 + $0x260] sm:$0xff] }
  0x31   :  { %v92_v9 = vld [vmem:[%s4442_s0 + $0x280] sm:$0xff] }
  0x33   :  { %329 = vadd.xlane.f32.xlu1 %v328_v50  ;;  %326 = vadd.xlane.f32.xlu0 %v325_v51  ;;  %v424_v50 = vsel %vm4445_vm0, %v69_v48, 0.0  ;;  %v421_v51 = vsel %vm4445_vm0, %v68_v49, 0.0  ;;  %v484_v49 = vsel %vm4445_vm0, %v89_v36, 0.0 }
  0x37   :  { %335 = vadd.xlane.f32.xlu1 %v334_v54  ;;  %332 = vadd.xlane.f32.xlu0 %v331_v55  ;;  %v430_v54 = vsel %vm4445_vm0, %v71_v52, 0.0  ;;  %v427_v55 = vsel %vm4445_vm0, %v70_v53, 0.0  ;;  %v481_v52 = vsel %vm4445_vm0, %v88_v41, 0.0 }
  0x3b   :  { %341 = vadd.xlane.f32.xlu1 %v340_v58  ;;  %338 = vadd.xlane.f32.xlu0 %v337_v59  ;;  %v436_v58 = vsel %vm4445_vm0, %v73_v56, 0.0  ;;  %v433_v59 = vsel %vm4445_vm0, %v72_v57, 0.0 }
  0x3f   :  { %347 = vadd.xlane.f32.xlu1 %v346_v62  ;;  %344 = vadd.xlane.f32.xlu0 %v343_v63  ;;  %v442_v62 = vsel %vm4445_vm0, %v75_v60, 0.0  ;;  %v439_v63 = vsel %vm4445_vm0, %v74_v61, 0.0 }
  0x43   :  { %353 = vadd.xlane.f32.xlu1 %v352_v2  ;;  %350 = vadd.xlane.f32.xlu0 %v349_v3  ;;  %v448_v2 = vsel %vm4445_vm0, %v77_v0, 0.0  ;;  %v445_v3 = vsel %vm4445_vm0, %v76_v1, 0.0 }
  0x47   :  { %359 = vadd.xlane.f32.xlu1 %v358_v6  ;;  %356 = vadd.xlane.f32.xlu0 %v355_v7  ;;  %v454_v6 = vsel %vm4445_vm0, %v79_v4, 0.0  ;;  %v451_v7 = vsel %vm4445_vm0, %v78_v5, 0.0 }
  0x4b   :  { %365 = vadd.xlane.f32.xlu1 %v364_v10  ;;  %362 = vadd.xlane.f32.xlu0 %v361_v11  ;;  %v1217_v10 = vlaneseq  ;;  %v460_v11 = vsel %vm4445_vm0, %v81_v8, 0.0  ;;  %v93_v8 = vld [vmem:[%s4442_s0 + $0x288] sm:$0xff] }
  0x4f   :  { %371 = vadd.xlane.f32.xlu1 %v370_v14  ;;  %368 = vadd.xlane.f32.xlu0 %v367_v15  ;;  %v82_v14 = vld [vmem:[%s4442_s0 + $0x230] sm:$0xff]  ;;  %v3099_v15 = vand.u32 127, %v1217_v10 }
  0x50   :  { %v463_v17 = vsel %vm4445_vm0, %v82_v14, 0.0 }
  0x51   :  { %v1223_v21 = vadd.s32 4294967288, %v3099_v15  ;;  %v1251_v32 = vadd.s32 4294967256, %v3099_v15  ;;  %v1244_v33 = vadd.s32 4294967264, %v3099_v15  ;;  %v1279_v60 = vadd.s32 4294967224, %v3099_v15 }
  0x52   :  { %v1272_v0 = vadd.s32 4294967232, %v3099_v15  ;;  %v1286_v14 = vadd.s32 4294967216, %v3099_v15 }
  0x53   :  { %377 = vadd.xlane.f32.xlu1 %v376_v18  ;;  %374 = vadd.xlane.f32.xlu0 %v373_v19  ;;  %v3103_v18 = vshrl.u32 %v1217_v10, 7  ;;  %v85_v19 = vld [vmem:[%s4442_s0 + $0x248] sm:$0xff]  ;;  %v1293_v10 = vadd.s32 4294967208, %v3099_v15 }
  0x55   :  { %v3118_v28 = vsub.s32 %v3099_v15, %v3103_v18  ;;  %v3121_v29 = vsub.s32 %v1223_v21, %v3103_v18  ;;  %v3195_v13 = vsub.s32 %v1272_v0, %v3103_v18 }
  0x57   :  { %383 = vadd.xlane.f32.xlu1 %v382_v22  ;;  %380 = vadd.xlane.f32.xlu0 %v379_v23  ;;  %v1230_v22 = vadd.s32 4294967280, %v3099_v15  ;;  %v1237_v23 = vadd.s32 4294967272, %v3099_v15 }
  0x5b   :  { %389 = vadd.xlane.f32.xlu1 %v388_v26  ;;  %386 = vadd.xlane.f32.xlu0 %v385_v27  ;;  %v472_v26 = vsel %vm4445_vm0, %v85_v19, 0.0  ;;  %v469_v27 = vsel %vm4445_vm0, %v84_v20, 0.0  ;;  %v493_v19 = vsel %vm4445_vm0, %v92_v9, 0.0  ;;  %v133_v9 = vld [vmem:[%s4442_s0 + $0x3c8] sm:$0xff] }
  0x5f   :  { %395 = vadd.xlane.f32.xlu1 %v394_v30  ;;  %392 = vadd.xlane.f32.xlu0 %v391_v31  ;;  %v87_v30 = vld [vmem:[%s4442_s0 + $0x258] sm:$0xff]  ;;  %v86_v31 = vld [vmem:[%s4442_s0 + $0x250] sm:$0xff] }
  0x60   :  { %v475_v40 = vsel %vm4445_vm0, %v86_v31, 0.0  ;;  %v3215_v31 = vsub.s32 %v1286_v14, %v3103_v18 }
  0x63   :  { %401 = vadd.xlane.f32.xlu1 %v400_v34  ;;  %398 = vadd.xlane.f32.xlu0 %v397_v35  ;;  %v3132_v34 = vsub.s32 %v1230_v22, %v3103_v18  ;;  %v3135_v35 = vsub.s32 %v1237_v23, %v3103_v18  ;;  %v3203_v23 = vsub.s32 %v1293_v10, %v3103_v18 }
  0x67   :  { %407 = vadd.xlane.f32.xlu1 %v406_v38  ;;  %404 = vadd.xlane.f32.xlu0 %v403_v39  ;;  %v478_v39 = vsel %vm4445_vm0, %v87_v30, 0.0 }
  0x6b   :  { %413 = vadd.xlane.f32.xlu1 %v412_v42  ;;  %410 = vadd.xlane.f32.xlu0 %v409_v43  ;;  %v1265_v42 = vadd.s32 4294967240, %v3099_v15  ;;  %v1258_v43 = vadd.s32 4294967248, %v3099_v15 }
  0x6d   :  { %v3162_v56 = vsub.s32 %v1265_v42, %v3103_v18  ;;  %v3165_v57 = vsub.s32 %v1258_v43, %v3103_v18  ;;  %v1321_v42 = vadd.s32 4294967176, %v3099_v15 }
  0x6f   :  { %419 = vadd.xlane.f32.xlu1 %v418_v46  ;;  %416 = vadd.xlane.f32.xlu0 %v415_v47  ;;  %v3150_v46 = vsub.s32 %v1251_v32, %v3103_v18  ;;  %v3153_v47 = vsub.s32 %v1244_v33, %v3103_v18  ;;  %v1300_v32 = vadd.s32 4294967200, %v3099_v15 }
  0x73   :  { %425 = vadd.xlane.f32.xlu1 %v424_v50  ;;  %422 = vadd.xlane.f32.xlu0 %v421_v51 }
  0x77   :  { %431 = vadd.xlane.f32.xlu1 %v430_v54  ;;  %428 = vadd.xlane.f32.xlu0 %v427_v55 }
  0x7b   :  { %437 = vadd.xlane.f32.xlu1 %v436_v58  ;;  %434 = vadd.xlane.f32.xlu0 %v433_v59  ;;  %v91_v58 = vld [vmem:[%s4442_s0 + $0x278] sm:$0xff]  ;;  %v90_v59 = vld [vmem:[%s4442_s0 + $0x270] sm:$0xff] }
  0x7f   :  { %443 = vadd.xlane.f32.xlu1 %v442_v62  ;;  %440 = vadd.xlane.f32.xlu0 %v439_v63 }
  0x83   :  { %449 = vadd.xlane.f32.xlu1 %v448_v2  ;;  %446 = vadd.xlane.f32.xlu0 %v445_v3  ;;  %v490_v2 = vsel %vm4445_vm0, %v91_v58, 0.0  ;;  %v487_v3 = vsel %vm4445_vm0, %v90_v59, 0.0  ;;  %v3243_v59 = vsub.s32 %v1321_v42, %v3103_v18 }
  0x87   :  { %455 = vadd.xlane.f32.xlu1 %v454_v6  ;;  %452 = vadd.xlane.f32.xlu0 %v451_v7  ;;  %v3183_v7 = vsub.s32 %v1279_v60, %v3103_v18 }
  0x8b   :  { %461 = vadd.xlane.f32.xlu1 %v460_v11  ;;  %458 = vadd.xlane.f32.xlu0 %v457_v12 }
  0x8f   :  { %467 = vadd.xlane.f32.xlu1 %v466_v16  ;;  %464 = vadd.xlane.f32.xlu0 %v463_v17  ;;  %v496_v17 = vsel %vm4445_vm0, %v93_v8, 0.0  ;;  %v150_v8 = vld [vmem:[%s4442_s0 + $0x450] sm:$0xff] }
  0x90   :  { %v261_v24 = vpop.xlane.xlu1 %260  ;;  %v255_v25 = vpop.xlane.xlu0 %254  ;;  %v667_v14 = vsel %vm4445_vm0, %v150_v8, 0.0 }
  0x91   :  { %v1222_v44 = vrot.slane %v255_v25, %v3118_v28  ;;  %v1234_v48 = vrot.slane %v261_v24, %v3132_v34  ;;  %v149_v24 = vld [vmem:[%s4442_s0 + $0x448] sm:$0xff]  ;;  %v148_v25 = vld [vmem:[%s4442_s0 + $0x440] sm:$0xff] }
  0x92   :  { %v664_v36 = vsel %vm4445_vm0, %v149_v24, 0.0 }
  0x93   :  { %473 = vadd.xlane.f32.xlu1 %v472_v26  ;;  %470 = vadd.xlane.f32.xlu0 %v469_v27  ;;  %v1307_v26 = vadd.s32 4294967192, %v3099_v15 }
  0x94   :  { %v264_v37 = vpop.xlane.xlu1 %263  ;;  %v258_v38 = vpop.xlane.xlu0 %257 }
  0x95   :  { %v1227_v45 = vrot.slane %v258_v38, %v3121_v29  ;;  %v1241_v50 = vrot.slane %v264_v37, %v3135_v35  ;;  %v661_v37 = vsel %vm4445_vm0, %v148_v25, 0.0  ;;  %v3223_v41 = vsub.s32 %v1307_v26, %v3103_v18 }
  0x97   :  { %v1229_v51 = vsel %vm1228_vm1, %v1227_v45, %v1222_v44  ;;  %479 = vadd.xlane.f32.xlu1 %v478_v39  ;;  %476 = vadd.xlane.f32.xlu0 %v475_v40  ;;  %v3229_v45 = vsub.s32 %v1300_v32, %v3103_v18 }
  0x98   :  { %v1236_v53 = vsel %vm1235_vm2, %v1234_v48, %v1229_v51  ;;  %v270_v54 = vpop.xlane.xlu1 %269  ;;  %v267_v55 = vpop.xlane.xlu0 %266  ;;  %v213_v48 = vld [vmem:[%s4442_s0 + $0x648] sm:$0xff] }
  0x99   :  { %v1255_v61 = vrot.slane %v270_v54, %v3150_v46  ;;  %v1243_v62 = vsel %vm1242_vm3, %v1241_v50, %v1236_v53  ;;  %v1248_v63 = vrot.slane %v267_v55, %v3153_v47  ;;  %v1314_v50 = vadd.s32 4294967184, %v3099_v15 }
  0x9a   :  { %v856_v55 = vsel %vm4445_vm0, %v213_v48, 0.0 }
  0x9b   :  { %v1250_v1 = vsel %vm1249_vm4, %v1248_v63, %v1243_v62  ;;  %485 = vadd.xlane.f32.xlu1 %v484_v49  ;;  %482 = vadd.xlane.f32.xlu0 %v481_v52  ;;  %v212_v49 = vld [vmem:[%s4442_s0 + $0x640] sm:$0xff]  ;;  %v94_v63 = vld [vmem:[%s4442_s0 + $0x290] sm:$0xff] }
  0x9c   :  { %v276_v4 = vpop.xlane.xlu1 %275  ;;  %v1257_v5 = vsel %vm1256_vm5, %v1255_v61, %v1250_v1  ;;  %v273_v6 = vpop.xlane.xlu0 %272  ;;  %v853_v58 = vsel %vm4445_vm0, %v212_v49, 0.0  ;;  %v3248_v61 = vsub.s32 %v1314_v50, %v3103_v18  ;;  %v132_v62 = vld [vmem:[%s4442_s0 + $0x3c0] sm:$0xff]  ;;  %v499_v18 = vsel %vm4445_vm0, %v94_v63, 0.0  ;;  %v151_v50 = vld [vmem:[%s4442_s0 + $0x458] sm:$0xff] }
  0x9d   :  { %v1269_v11 = vrot.slane %v276_v4, %v3162_v56  ;;  %v1262_v12 = vrot.slane %v273_v6, %v3165_v57  ;;  %v215_v63 = vld [vmem:[%s4442_s0 + $0x658] sm:$0xff] }
  0x9f   :  { %v1264_v16 = vsel %vm1263_vm6, %v1262_v12, %v1257_v5  ;;  %491 = vadd.xlane.f32.xlu1 %v490_v2  ;;  %488 = vadd.xlane.f32.xlu0 %v487_v3  ;;  %v613_v3 = vsel %vm4445_vm0, %v132_v62, 0.0 }
  0xa0   :  { %v282_v20 = vpop.xlane.xlu1 %281  ;;  %v1271_v21 = vsel %vm1270_vm7, %v1269_v11, %v1264_v16  ;;  %v279_v22 = vpop.xlane.xlu0 %278  ;;  %v616_v16 = vsel %vm4445_vm0, %v133_v9, 0.0  ;;  %v135_v9 = vld [vmem:[%s4442_s0 + $0x3d8] sm:$0xff] }
  0xa1   :  { %v1283_v27 = vrot.slane %v282_v20, %v3183_v7  ;;  %v1276_v30 = vrot.slane %v279_v22, %v3195_v13  ;;  %v196_v22 = vld [vmem:[%s4442_s0 + $0x5c0] sm:$0xff] }
  0xa3   :  { %v1278_v33 = vsel %vm1277_vm8, %v1276_v30, %v1271_v21  ;;  %497 = vadd.xlane.f32.xlu1 %v496_v17  ;;  %494 = vadd.xlane.f32.xlu0 %v493_v19  ;;  %v197_v21 = vld [vmem:[%s4442_s0 + $0x5c8] sm:$0xff]  ;;  %v805_v30 = vsel %vm4445_vm0, %v196_v22, 0.0 }
  0xa4   :  { %v288_v38 = vpop.xlane.xlu1 %287  ;;  %v1285_v39 = vsel %vm1284_vm9, %v1283_v27, %v1278_v33  ;;  %v285_v40 = vpop.xlane.xlu0 %284  ;;  %v808_v27 = vsel %vm4445_vm0, %v197_v21, 0.0 }
  0xa5   :  { %v1297_v43 = vrot.slane %v288_v38, %v3203_v23  ;;  %v1290_v44 = vrot.slane %v285_v40, %v3215_v31 }
  0xa7   :  { %v1292_v51 = vsel %vm1291_vm10, %v1290_v44, %v1285_v39  ;;  %665 = vadd.xlane.f32.xlu1 %v664_v36  ;;  %662 = vadd.xlane.f32.xlu0 %v661_v37  ;;  %v95_v36 = vld [vmem:[%s4442_s0 + $0x298] sm:$0xff]  ;;  %v214_v37 = vld [vmem:[%s4442_s0 + $0x650] sm:$0xff] }
  0xa8   :  { %v294_v52 = vpop.xlane.xlu1 %293  ;;  %v1299_v53 = vsel %vm1298_vm11, %v1297_v43, %v1292_v51  ;;  %v291_v54 = vpop.xlane.xlu0 %290  ;;  %v502_v43 = vsel %vm4445_vm0, %v95_v36, 0.0  ;;  %v859_v44 = vsel %vm4445_vm0, %v214_v37, 0.0  ;;  %v134_v51 = vld [vmem:[%s4442_s0 + $0x3d0] sm:$0xff] }
  0xa9   :  { %v1311_v60 = vrot.slane %v294_v52, %v3223_v41  ;;  %v1304_v15 = vrot.slane %v291_v54, %v3229_v45 }
  0xab   :  { %v1306_v0 = vsel %vm1305_vm12, %v1304_v15, %v1299_v53  ;;  %857 = vadd.xlane.f32.xlu1 %v856_v55  ;;  %854 = vadd.xlane.f32.xlu0 %v853_v58  ;;  %v670_v58 = vsel %vm4445_vm0, %v151_v50, 0.0 }
  0xac   :  { %v300_v1 = vpop.xlane.xlu1 %299  ;;  %v297_v2 = vpop.xlane.xlu0 %296  ;;  %v1313_v4 = vsel %vm1312_vm13, %v1311_v60, %v1306_v0  ;;  %v619_v60 = vsel %vm4445_vm0, %v134_v51, 0.0  ;;  %v198_v0 = vld [vmem:[%s4442_s0 + $0x5d0] sm:$0xff] }
  0xad   :  { %v1325_v5 = vrot.slane %v300_v1, %v3243_v59  ;;  %v1318_v6 = vrot.slane %v297_v2, %v3248_v61 }
  0xaf   :  { %614 = vadd.xlane.f32.xlu1 %v613_v3  ;;  %500 = vadd.xlane.f32.xlu0 %v499_v18  ;;  %v1320_v10 = vsel %vm1319_vm14, %v1318_v6, %v1313_v4  ;;  %v862_v4 = vsel %vm4445_vm0, %v215_v63, 0.0 }
  0xb0   :  { %v306_v11 = vpop.xlane.xlu1 %305  ;;  %v303_v12 = vpop.xlane.xlu0 %302  ;;  %v3272_v17 = vsel %vm1326_vm15, %v1325_v5, %v1320_v10  ;;  %v811_v5 = vsel %vm4445_vm0, %v198_v0, 0.0  ;;  %v96_v10 = vld [vmem:[%s4442_s0 + $0x2a0] sm:$0xff] }
  0xb1   :  { %v1335_v19 = vrot.slane %v306_v11, %v3121_v29  ;;  %v1331_v20 = vrot.slane %v303_v12, %v3118_v28 }
  0xb3   :  { %v1336_v24 = vsel %vm1228_vm1, %v1335_v19, %v1331_v20  ;;  %668 = vadd.xlane.f32.xlu1 %v667_v14  ;;  %617 = vadd.xlane.f32.xlu0 %v616_v16  ;;  %v622_v19 = vsel %vm4445_vm0, %v135_v9, 0.0  ;;  %v505_v20 = vsel %vm4445_vm0, %v96_v10, 0.0 }
  0xb4   :  { %v312_v25 = vpop.xlane.xlu1 %311  ;;  %v309_v26 = vpop.xlane.xlu0 %308 }
  0xb5   :  { %v1345_v32 = vrot.slane %v312_v25, %v3135_v35  ;;  %v1340_v33 = vrot.slane %v309_v26, %v3132_v34  ;;  %v152_v25 = vld [vmem:[%s4442_s0 + $0x460] sm:$0xff] }
  0xb6   :  { %v673_v36 = vsel %vm4445_vm0, %v152_v25, 0.0 }
  0xb7   :  { %v1341_v38 = vsel %vm1235_vm2, %v1340_v33, %v1336_v24  ;;  %809 = vadd.xlane.f32.xlu1 %v808_v27  ;;  %806 = vadd.xlane.f32.xlu0 %v805_v30  ;;  %v199_v24 = vld [vmem:[%s4442_s0 + $0x5d8] sm:$0xff] }
  0xb8   :  { %v318_v39 = vpop.xlane.xlu1 %317  ;;  %v1346_v40 = vsel %vm1242_vm3, %v1345_v32, %v1341_v38  ;;  %v315_v42 = vpop.xlane.xlu0 %314  ;;  %v814_v33 = vsel %vm4445_vm0, %v199_v24, 0.0 }
  0xb9   :  { %v1355_v48 = vrot.slane %v318_v39, %v3150_v46  ;;  %v1350_v49 = vrot.slane %v315_v42, %v3153_v47  ;;  %v97_v39 = vld [vmem:[%s4442_s0 + $0x2a8] sm:$0xff] }
  0xbb   :  { %v1351_v52 = vsel %vm1249_vm4, %v1350_v49, %v1346_v40  ;;  %503 = vadd.xlane.f32.xlu1 %v502_v43  ;;  %860 = vadd.xlane.f32.xlu0 %v859_v44  ;;  %v216_v40 = vld [vmem:[%s4442_s0 + $0x660] sm:$0xff] }
  0xbc   :  { %v324_v53 = vpop.xlane.xlu1 %323  ;;  %v1356_v54 = vsel %vm1256_vm5, %v1355_v48, %v1351_v52  ;;  %v321_v55 = vpop.xlane.xlu0 %320  ;;  %v508_v48 = vsel %vm4445_vm0, %v97_v39, 0.0  ;;  %v865_v49 = vsel %vm4445_vm0, %v216_v40, 0.0 }
  0xbd   :  { %v1365_v15 = vrot.slane %v324_v53, %v3162_v56  ;;  %v1360_v62 = vrot.slane %v321_v55, %v3165_v57  ;;  %v153_v53 = vld [vmem:[%s4442_s0 + $0x468] sm:$0xff] }
  0xbf   :  { %v1361_v1 = vsel %vm1263_vm6, %v1360_v62, %v1356_v54  ;;  %671 = vadd.xlane.f32.xlu1 %v670_v58  ;;  %620 = vadd.xlane.f32.xlu0 %v619_v60  ;;  %v136_v54 = vld [vmem:[%s4442_s0 + $0x3e0] sm:$0xff] }
  0xc0   :  { %v330_v2 = vpop.xlane.xlu1 %329  ;;  %v1366_v3 = vsel %vm1270_vm7, %v1365_v15, %v1361_v1  ;;  %v327_v18 = vpop.xlane.xlu0 %326  ;;  %v676_v15 = vsel %vm4445_vm0, %v153_v53, 0.0  ;;  %v625_v62 = vsel %vm4445_vm0, %v136_v54, 0.0 }
  0xc1   :  { %v1375_v6 = vrot.slane %v330_v2, %v3183_v7  ;;  %v1370_v8 = vrot.slane %v327_v18, %v3195_v13  ;;  %v217_v2 = vld [vmem:[%s4442_s0 + $0x668] sm:$0xff] }
  0xc3   :  { %v1371_v11 = vsel %vm1277_vm8, %v1370_v8, %v1366_v3  ;;  %863 = vadd.xlane.f32.xlu1 %v862_v4  ;;  %812 = vadd.xlane.f32.xlu0 %v811_v5  ;;  %v200_v3 = vld [vmem:[%s4442_s0 + $0x5e0] sm:$0xff] }
  0xc4   :  { %v336_v12 = vpop.xlane.xlu1 %335  ;;  %v1376_v14 = vsel %vm1284_vm9, %v1375_v6, %v1371_v11  ;;  %v333_v16 = vpop.xlane.xlu0 %332  ;;  %v868_v6 = vsel %vm4445_vm0, %v217_v2, 0.0  ;;  %v817_v8 = vsel %vm4445_vm0, %v200_v3, 0.0  ;;  %v137_v11 = vld [vmem:[%s4442_s0 + $0x3e8] sm:$0xff] }
  0xc5   :  { %v1385_v21 = vrot.slane %v336_v12, %v3203_v23  ;;  %v1380_v22 = vrot.slane %v333_v16, %v3215_v31  ;;  %v98_v12 = vld [vmem:[%s4442_s0 + $0x2b0] sm:$0xff] }
  0xc7   :  { %v1381_v26 = vsel %vm1291_vm10, %v1380_v22, %v1376_v14  ;;  %623 = vadd.xlane.f32.xlu1 %v622_v19  ;;  %506 = vadd.xlane.f32.xlu0 %v505_v20  ;;  %v511_v22 = vsel %vm4445_vm0, %v98_v12, 0.0 }
  0xc8   :  { %v342_v27 = vpop.xlane.xlu1 %341  ;;  %v1386_v30 = vsel %vm1298_vm11, %v1385_v21, %v1381_v26  ;;  %v339_v32 = vpop.xlane.xlu0 %338  ;;  %v628_v21 = vsel %vm4445_vm0, %v137_v11, 0.0  ;;  %v201_v26 = vld [vmem:[%s4442_s0 + $0x5e8] sm:$0xff] }
  0xc9   :  { %v1395_v37 = vrot.slane %v342_v27, %v3223_v41  ;;  %v1390_v38 = vrot.slane %v339_v32, %v3229_v45  ;;  %v154_v27 = vld [vmem:[%s4442_s0 + $0x470] sm:$0xff] }
  0xcb   :  { %v1391_v42 = vsel %vm1305_vm12, %v1390_v38, %v1386_v30  ;;  %815 = vadd.xlane.f32.xlu1 %v814_v33  ;;  %674 = vadd.xlane.f32.xlu0 %v673_v36  ;;  %v679_v38 = vsel %vm4445_vm0, %v154_v27, 0.0 }
  0xcc   :  { %v348_v43 = vpop.xlane.xlu1 %347  ;;  %v345_v44 = vpop.xlane.xlu0 %344  ;;  %v1396_v50 = vsel %vm1312_vm13, %v1395_v37, %v1391_v42  ;;  %v820_v37 = vsel %vm4445_vm0, %v201_v26, 0.0  ;;  %v99_v42 = vld [vmem:[%s4442_s0 + $0x2b8] sm:$0xff] }
  0xcd   :  { %v1405_v51 = vrot.slane %v348_v43, %v3243_v59  ;;  %v1400_v52 = vrot.slane %v345_v44, %v3248_v61  ;;  %v218_v43 = vld [vmem:[%s4442_s0 + $0x670] sm:$0xff] }
  0xcf   :  { %509 = vadd.xlane.f32.xlu1 %v508_v48  ;;  %866 = vadd.xlane.f32.xlu0 %v865_v49  ;;  %v1401_v55 = vsel %vm1319_vm14, %v1400_v52, %v1396_v50  ;;  %v871_v52 = vsel %vm4445_vm0, %v218_v43, 0.0 }
  0xd0   :  { %v354_v58 = vpop.xlane.xlu1 %353  ;;  %v351_v60 = vpop.xlane.xlu0 %350  ;;  %v3369_v63 = vsel %vm1326_vm15, %v1405_v51, %v1401_v55  ;;  %v514_v51 = vsel %vm4445_vm0, %v99_v42, 0.0  ;;  %v155_v55 = vld [vmem:[%s4442_s0 + $0x478] sm:$0xff] }
  0xd1   :  { %v1414_v0 = vrot.slane %v354_v58, %v3121_v29  ;;  %v1410_v1 = vrot.slane %v351_v60, %v3118_v28  ;;  %v138_v58 = vld [vmem:[%s4442_s0 + $0x3f0] sm:$0xff] }
  0xd2   :  { %v631_v2 = vsel %vm4445_vm0, %v138_v58, 0.0 }
  0xd3   :  { %v1415_v18 = vsel %vm1228_vm1, %v1414_v0, %v1410_v1  ;;  %677 = vadd.xlane.f32.xlu1 %v676_v15  ;;  %626 = vadd.xlane.f32.xlu0 %v625_v62  ;;  %v682_v1 = vsel %vm4445_vm0, %v155_v55, 0.0 }
  0xd4   :  { %v360_v4 = vpop.xlane.xlu1 %359  ;;  %v357_v5 = vpop.xlane.xlu0 %356 }
  0xd5   :  { %v1424_v9 = vrot.slane %v360_v4, %v3135_v35  ;;  %v1419_v10 = vrot.slane %v357_v5, %v3132_v34  ;;  %v219_v4 = vld [vmem:[%s4442_s0 + $0x678] sm:$0xff]  ;;  %v202_v5 = vld [vmem:[%s4442_s0 + $0x5f0] sm:$0xff] }
  0xd6   :  { %v874_v11 = vsel %vm4445_vm0, %v219_v4, 0.0  ;;  %v823_v12 = vsel %vm4445_vm0, %v202_v5, 0.0 }
  0xd7   :  { %v1420_v14 = vsel %vm1235_vm2, %v1419_v10, %v1415_v18  ;;  %869 = vadd.xlane.f32.xlu1 %v868_v6  ;;  %818 = vadd.xlane.f32.xlu0 %v817_v8 }
  0xd8   :  { %v366_v16 = vpop.xlane.xlu1 %365  ;;  %v1425_v19 = vsel %vm1242_vm3, %v1424_v9, %v1420_v14  ;;  %v363_v20 = vpop.xlane.xlu0 %362 }
  0xd9   :  { %v1434_v24 = vrot.slane %v366_v16, %v3150_v46  ;;  %v1429_v25 = vrot.slane %v363_v20, %v3153_v47  ;;  %v100_v20 = vld [vmem:[%s4442_s0 + $0x2c0] sm:$0xff] }
  0xda   :  { %v517_v27 = vsel %vm4445_vm0, %v100_v20, 0.0 }
  0xdb   :  { %v1430_v30 = vsel %vm1249_vm4, %v1429_v25, %v1425_v19  ;;  %629 = vadd.xlane.f32.xlu1 %v628_v21  ;;  %512 = vadd.xlane.f32.xlu0 %v511_v22  ;;  %v139_v19 = vld [vmem:[%s4442_s0 + $0x3f8] sm:$0xff] }
  0xdc   :  { %v372_v32 = vpop.xlane.xlu1 %371  ;;  %v1435_v33 = vsel %vm1256_vm5, %v1434_v24, %v1430_v30  ;;  %v369_v36 = vpop.xlane.xlu0 %368  ;;  %v634_v26 = vsel %vm4445_vm0, %v139_v19, 0.0 }
  0xdd   :  { %v1444_v39 = vrot.slane %v372_v32, %v3162_v56  ;;  %v1439_v40 = vrot.slane %v369_v36, %v3165_v57  ;;  %v156_v36 = vld [vmem:[%s4442_s0 + $0x480] sm:$0xff] }
  0xde   :  { %v685_v42 = vsel %vm4445_vm0, %v156_v36, 0.0 }
  0xdf   :  { %v1440_v44 = vsel %vm1263_vm6, %v1439_v40, %v1435_v33  ;;  %821 = vadd.xlane.f32.xlu1 %v820_v37  ;;  %680 = vadd.xlane.f32.xlu0 %v679_v38  ;;  %v203_v33 = vld [vmem:[%s4442_s0 + $0x5f8] sm:$0xff] }
  0xe0   :  { %v378_v48 = vpop.xlane.xlu1 %377  ;;  %v1445_v49 = vsel %vm1270_vm7, %v1444_v39, %v1440_v44  ;;  %v375_v50 = vpop.xlane.xlu0 %374  ;;  %v826_v40 = vsel %vm4445_vm0, %v203_v33, 0.0 }
  0xe1   :  { %v1454_v53 = vrot.slane %v378_v48, %v3183_v7  ;;  %v1449_v54 = vrot.slane %v375_v50, %v3195_v13  ;;  %v220_v50 = vld [vmem:[%s4442_s0 + $0x680] sm:$0xff] }
  0xe2   :  { %v877_v55 = vsel %vm4445_vm0, %v220_v50, 0.0 }
  0xe3   :  { %v1450_v60 = vsel %vm1277_vm8, %v1449_v54, %v1445_v49  ;;  %515 = vadd.xlane.f32.xlu1 %v514_v51  ;;  %872 = vadd.xlane.f32.xlu0 %v871_v52  ;;  %v101_v49 = vld [vmem:[%s4442_s0 + $0x2c8] sm:$0xff] }
  0xe4   :  { %v384_v15 = vpop.xlane.xlu1 %383  ;;  %v1455_v62 = vsel %vm1284_vm9, %v1454_v53, %v1450_v60  ;;  %v381_v0 = vpop.xlane.xlu0 %380  ;;  %v520_v54 = vsel %vm4445_vm0, %v101_v49, 0.0 }
  0xe5   :  { %v1464_v3 = vrot.slane %v384_v15, %v3203_v23  ;;  %v1459_v18 = vrot.slane %v381_v0, %v3215_v31  ;;  %v157_v15 = vld [vmem:[%s4442_s0 + $0x488] sm:$0xff] }
  0xe7   :  { %v1460_v6 = vsel %vm1291_vm10, %v1459_v18, %v1455_v62  ;;  %683 = vadd.xlane.f32.xlu1 %v682_v1  ;;  %632 = vadd.xlane.f32.xlu0 %v631_v2  ;;  %v140_v62 = vld [vmem:[%s4442_s0 + $0x400] sm:$0xff]  ;;  %v688_v18 = vsel %vm4445_vm0, %v157_v15, 0.0 }
  0xe8   :  { %v390_v8 = vpop.xlane.xlu1 %389  ;;  %v1465_v9 = vsel %vm1298_vm11, %v1464_v3, %v1460_v6  ;;  %v387_v10 = vpop.xlane.xlu0 %386  ;;  %v637_v4 = vsel %vm4445_vm0, %v140_v62, 0.0 }
  0xe9   :  { %v1474_v14 = vrot.slane %v390_v8, %v3223_v41  ;;  %v1469_v16 = vrot.slane %v387_v10, %v3229_v45  ;;  %v181_v8 = vld [vmem:[%s4442_s0 + $0x548] sm:$0xff] }
  0xeb   :  { %v1470_v21 = vsel %vm1305_vm12, %v1469_v16, %v1465_v9  ;;  %875 = vadd.xlane.f32.xlu1 %v874_v11  ;;  %824 = vadd.xlane.f32.xlu0 %v823_v12  ;;  %v180_v9 = vld [vmem:[%s4442_s0 + $0x540] sm:$0xff]  ;;  %v760_v16 = vsel %vm4445_vm0, %v181_v8, 0.0 }
  0xec   :  { %v396_v22 = vpop.xlane.xlu1 %395  ;;  %v1475_v24 = vsel %vm1312_vm13, %v1474_v14, %v1470_v21  ;;  %v393_v25 = vpop.xlane.xlu0 %392  ;;  %v757_v19 = vsel %vm4445_vm0, %v180_v9, 0.0 }
  0xed   :  { %v1484_v30 = vrot.slane %v396_v22, %v3243_v59  ;;  %v1479_v32 = vrot.slane %v393_v25, %v3248_v61  ;;  %v221_v22 = vld [vmem:[%s4442_s0 + $0x688] sm:$0xff] }
  0xef   :  { %v1480_v37 = vsel %vm1319_vm14, %v1479_v32, %v1475_v24  ;;  %635 = vadd.xlane.f32.xlu1 %v634_v26  ;;  %518 = vadd.xlane.f32.xlu0 %v517_v27  ;;  %v204_v24 = vld [vmem:[%s4442_s0 + $0x600] sm:$0xff]  ;;  %v880_v32 = vsel %vm4445_vm0, %v221_v22, 0.0 }
  0xf0   :  { %v402_v38 = vpop.xlane.xlu1 %401  ;;  %v399_v39 = vpop.xlane.xlu0 %398  ;;  %v3466_v43 = vsel %vm1326_vm15, %v1484_v30, %v1480_v37  ;;  %v829_v33 = vsel %vm4445_vm0, %v204_v24, 0.0 }
  0xf1   :  { %v1493_v44 = vrot.slane %v402_v38, %v3121_v29  ;;  %v1489_v48 = vrot.slane %v399_v39, %v3118_v28  ;;  %v108_v38 = vld [vmem:[%s4442_s0 + $0x300] sm:$0xff]  ;;  %v102_v39 = vld [vmem:[%s4442_s0 + $0x2d0] sm:$0xff] }
  0xf2   :  { %v541_v49 = vsel %vm4445_vm0, %v108_v38, 0.0  ;;  %v523_v50 = vsel %vm4445_vm0, %v102_v39, 0.0 }
  0xf3   :  { %v1494_v51 = vsel %vm1228_vm1, %v1493_v44, %v1489_v48  ;;  %827 = vadd.xlane.f32.xlu1 %v826_v40  ;;  %686 = vadd.xlane.f32.xlu0 %v685_v42 }
  0xf4   :  { %v408_v52 = vpop.xlane.xlu1 %407  ;;  %v405_v53 = vpop.xlane.xlu0 %404 }
  0xf5   :  { %v1503_v58 = vrot.slane %v408_v52, %v3135_v35  ;;  %v1498_v60 = vrot.slane %v405_v53, %v3132_v34  ;;  %v141_v53 = vld [vmem:[%s4442_s0 + $0x408] sm:$0xff] }
  0xf6   :  { %v640_v62 = vsel %vm4445_vm0, %v141_v53, 0.0 }
  0xf7   :  { %v1499_v0 = vsel %vm1235_vm2, %v1498_v60, %v1494_v51  ;;  %521 = vadd.xlane.f32.xlu1 %v520_v54  ;;  %878 = vadd.xlane.f32.xlu0 %v877_v55  ;;  %v109_v54 = vld [vmem:[%s4442_s0 + $0x308] sm:$0xff] }
  0xf8   :  { %v414_v1 = vpop.xlane.xlu1 %413  ;;  %v1504_v2 = vsel %vm1242_vm3, %v1503_v58, %v1499_v0  ;;  %v411_v3 = vpop.xlane.xlu0 %410  ;;  %v544_v0 = vsel %vm4445_vm0, %v109_v54, 0.0 }
  0xf9   :  { %v1513_v5 = vrot.slane %v414_v1, %v3150_v46  ;;  %v1508_v6 = vrot.slane %v411_v3, %v3153_v47  ;;  %v164_v3 = vld [vmem:[%s4442_s0 + $0x4c0] sm:$0xff] }
  0xfa   :  { %v709_v8 = vsel %vm4445_vm0, %v164_v3, 0.0 }
  0xfb   :  { %v1509_v10 = vsel %vm1249_vm4, %v1508_v6, %v1504_v2  ;;  %689 = vadd.xlane.f32.xlu1 %v688_v18  ;;  %638 = vadd.xlane.f32.xlu0 %v637_v4  ;;  %v158_v18 = vld [vmem:[%s4442_s0 + $0x490] sm:$0xff] }
  0xfc   :  { %v420_v11 = vpop.xlane.xlu1 %419  ;;  %v1514_v12 = vsel %vm1256_vm5, %v1513_v5, %v1509_v10  ;;  %v417_v14 = vpop.xlane.xlu0 %416  ;;  %v691_v9 = vsel %vm4445_vm0, %v158_v18, 0.0 }
  0xfd   :  { %v1523_v20 = vrot.slane %v420_v11, %v3162_v56  ;;  %v1518_v21 = vrot.slane %v417_v14, %v3165_v57  ;;  %v182_v14 = vld [vmem:[%s4442_s0 + $0x550] sm:$0xff] }
  0xfe   :  { %v763_v22 = vsel %vm4445_vm0, %v182_v14, 0.0 }
  0xff   :  { %v1519_v25 = vsel %vm1263_vm6, %v1518_v21, %v1514_v12  ;;  %761 = vadd.xlane.f32.xlu1 %v760_v16  ;;  %758 = vadd.xlane.f32.xlu0 %v757_v19  ;;  %v165_v16 = vld [vmem:[%s4442_s0 + $0x4c8] sm:$0xff] }
 0x100   :  { %v426_v26 = vpop.xlane.xlu1 %425  ;;  %v1524_v27 = vsel %vm1270_vm7, %v1523_v20, %v1519_v25  ;;  %v423_v30 = vpop.xlane.xlu0 %422  ;;  %v712_v24 = vsel %vm4445_vm0, %v165_v16, 0.0 }
 0x101   :  { %v1533_v36 = vrot.slane %v426_v26, %v3183_v7  ;;  %v1528_v37 = vrot.slane %v423_v30, %v3195_v13  ;;  %v222_v30 = vld [vmem:[%s4442_s0 + $0x690] sm:$0xff] }
 0x102   :  { %v883_v38 = vsel %vm4445_vm0, %v222_v30, 0.0 }
 0x103   :  { %v1529_v40 = vsel %vm1277_vm8, %v1528_v37, %v1524_v27  ;;  %881 = vadd.xlane.f32.xlu1 %v880_v32  ;;  %830 = vadd.xlane.f32.xlu0 %v829_v33  ;;  %v205_v32 = vld [vmem:[%s4442_s0 + $0x608] sm:$0xff] }
 0x104   :  { %v432_v42 = vpop.xlane.xlu1 %431  ;;  %v1534_v44 = vsel %vm1284_vm9, %v1533_v36, %v1529_v40  ;;  %v429_v48 = vpop.xlane.xlu0 %428  ;;  %v832_v39 = vsel %vm4445_vm0, %v205_v32, 0.0 }
 0x105   :  { %v1543_v51 = vrot.slane %v432_v42, %v3203_v23  ;;  %v1538_v52 = vrot.slane %v429_v48, %v3215_v31  ;;  %v228_v48 = vld [vmem:[%s4442_s0 + $0x6c0] sm:$0xff] }
 0x106   :  { %v901_v54 = vsel %vm4445_vm0, %v228_v48, 0.0 }
 0x107   :  { %v1539_v55 = vsel %vm1291_vm10, %v1538_v52, %v1534_v44  ;;  %542 = vadd.xlane.f32.xlu1 %v541_v49  ;;  %524 = vadd.xlane.f32.xlu0 %v523_v50  ;;  %v229_v44 = vld [vmem:[%s4442_s0 + $0x6c8] sm:$0xff] }
 0x108   :  { %v438_v58 = vpop.xlane.xlu1 %437  ;;  %v1544_v60 = vsel %vm1298_vm11, %v1543_v51, %v1539_v55  ;;  %v435_v15 = vpop.xlane.xlu0 %434  ;;  %v904_v53 = vsel %vm4445_vm0, %v229_v44, 0.0 }
 0x109   :  { %v1553_v1 = vrot.slane %v438_v58, %v3223_v41  ;;  %v1548_v2 = vrot.slane %v435_v15, %v3229_v45  ;;  %v103_v15 = vld [vmem:[%s4442_s0 + $0x2d8] sm:$0xff] }
 0x10a   :  { %v526_v18 = vsel %vm4445_vm0, %v103_v15, 0.0 }
 0x10b   :  { %v1549_v4 = vsel %vm1305_vm12, %v1548_v2, %v1544_v60  ;;  %641 = vadd.xlane.f32.xlu1 %v640_v62  ;;  %545 = vadd.xlane.f32.xlu0 %v544_v0  ;;  %v110_v60 = vld [vmem:[%s4442_s0 + $0x310] sm:$0xff] }
 0x10c   :  { %v444_v5 = vpop.xlane.xlu1 %443  ;;  %v441_v6 = vpop.xlane.xlu0 %440  ;;  %v1554_v10 = vsel %vm1312_vm13, %v1553_v1, %v1549_v4  ;;  %v547_v3 = vsel %vm4445_vm0, %v110_v60, 0.0 }
 0x10d   :  { %v1563_v11 = vrot.slane %v444_v5, %v3243_v59  ;;  %v1558_v12 = vrot.slane %v441_v6, %v3248_v61  ;;  %v159_v6 = vld [vmem:[%s4442_s0 + $0x498] sm:$0xff] }
 0x10e   :  { %v694_v14 = vsel %vm4445_vm0, %v159_v6, 0.0 }
 0x10f   :  { %710 = vadd.xlane.f32.xlu1 %v709_v8  ;;  %692 = vadd.xlane.f32.xlu0 %v691_v9  ;;  %v1559_v19 = vsel %vm1319_vm14, %v1558_v12, %v1554_v10  ;;  %v142_v8 = vld [vmem:[%s4442_s0 + $0x410] sm:$0xff] }
 0x110   :  { %v450_v20 = vpop.xlane.xlu1 %449  ;;  %v447_v21 = vpop.xlane.xlu0 %446  ;;  %v3563_v25 = vsel %vm1326_vm15, %v1563_v11, %v1559_v19  ;;  %v643_v16 = vsel %vm4445_vm0, %v142_v8, 0.0 }
 0x111   :  { %v1572_v26 = vrot.slane %v450_v20, %v3121_v29  ;;  %v1568_v27 = vrot.slane %v447_v21, %v3118_v28  ;;  %v183_v21 = vld [vmem:[%s4442_s0 + $0x558] sm:$0xff] }
 0x112   :  { %v766_v32 = vsel %vm4445_vm0, %v183_v21, 0.0 }
 0x113   :  { %v1573_v33 = vsel %vm1228_vm1, %v1572_v26, %v1568_v27  ;;  %764 = vadd.xlane.f32.xlu1 %v763_v22  ;;  %713 = vadd.xlane.f32.xlu0 %v712_v24  ;;  %v166_v22 = vld [vmem:[%s4442_s0 + $0x4d0] sm:$0xff] }
 0x114   :  { %v456_v36 = vpop.xlane.xlu1 %455  ;;  %v453_v37 = vpop.xlane.xlu0 %452 }
 0x115   :  { %v1582_v40 = vrot.slane %v456_v36, %v3135_v35  ;;  %v1577_v42 = vrot.slane %v453_v37, %v3132_v34 }
 0x117   :  { %v1578_v49 = vsel %vm1235_vm2, %v1577_v42, %v1573_v33  ;;  %884 = vadd.xlane.f32.xlu1 %v883_v38  ;;  %833 = vadd.xlane.f32.xlu0 %v832_v39  ;;  %v715_v33 = vsel %vm4445_vm0, %v166_v22, 0.0  ;;  %v223_v38 = vld [vmem:[%s4442_s0 + $0x698] sm:$0xff]  ;;  %v206_v39 = vld [vmem:[%s4442_s0 + $0x610] sm:$0xff] }
 0x118   :  { %v462_v50 = vpop.xlane.xlu1 %461  ;;  %v1583_v51 = vsel %vm1242_vm3, %v1582_v40, %v1578_v49  ;;  %v459_v52 = vpop.xlane.xlu0 %458  ;;  %v886_v49 = vsel %vm4445_vm0, %v223_v38, 0.0 }
 0x119   :  { %v1592_v55 = vrot.slane %v462_v50, %v3150_v46  ;;  %v1587_v58 = vrot.slane %v459_v52, %v3153_v47  ;;  %v835_v50 = vsel %vm4445_vm0, %v206_v39, 0.0 }
 0x11b   :  { %v1588_v62 = vsel %vm1249_vm4, %v1587_v58, %v1583_v51  ;;  %905 = vadd.xlane.f32.xlu1 %v904_v53  ;;  %902 = vadd.xlane.f32.xlu0 %v901_v54  ;;  %v104_v53 = vld [vmem:[%s4442_s0 + $0x2e0] sm:$0xff]  ;;  %v230_v54 = vld [vmem:[%s4442_s0 + $0x6d0] sm:$0xff] }
 0x11c   :  { %v468_v0 = vpop.xlane.xlu1 %467  ;;  %v1593_v1 = vsel %vm1256_vm5, %v1592_v55, %v1588_v62  ;;  %v465_v2 = vpop.xlane.xlu0 %464  ;;  %v529_v15 = vsel %vm4445_vm0, %v104_v53, 0.0  ;;  %v907_v62 = vsel %vm4445_vm0, %v230_v54, 0.0 }
 0x11d   :  { %v1602_v4 = vrot.slane %v468_v0, %v3162_v56  ;;  %v1597_v5 = vrot.slane %v465_v2, %v3165_v57 }
 0x11f   :  { %v1598_v9 = vsel %vm1263_vm6, %v1597_v5, %v1593_v1  ;;  %548 = vadd.xlane.f32.xlu1 %v547_v3  ;;  %527 = vadd.xlane.f32.xlu0 %v526_v18  ;;  %v143_v3 = vld [vmem:[%s4442_s0 + $0x418] sm:$0xff] }
 0x120   :  { %v474_v10 = vpop.xlane.xlu1 %473  ;;  %v1603_v11 = vsel %vm1270_vm7, %v1602_v4, %v1598_v9  ;;  %v471_v12 = vpop.xlane.xlu0 %470  ;;  %v111_v18 = vld [vmem:[%s4442_s0 + $0x318] sm:$0xff]  ;;  %v646_v8 = vsel %vm4445_vm0, %v143_v3, 0.0 }
 0x121   :  { %v1612_v19 = vrot.slane %v474_v10, %v3183_v7  ;;  %v1607_v20 = vrot.slane %v471_v12, %v3195_v13  ;;  %v550_v9 = vsel %vm4445_vm0, %v111_v18, 0.0 }
 0x123   :  { %v1608_v24 = vsel %vm1277_vm8, %v1607_v20, %v1603_v11  ;;  %695 = vadd.xlane.f32.xlu1 %v694_v14  ;;  %644 = vadd.xlane.f32.xlu0 %v643_v16  ;;  %v167_v14 = vld [vmem:[%s4442_s0 + $0x4d8] sm:$0xff]  ;;  %v160_v16 = vld [vmem:[%s4442_s0 + $0x4a0] sm:$0xff] }
 0x124   :  { %v480_v26 = vpop.xlane.xlu1 %479  ;;  %v1613_v27 = vsel %vm1284_vm9, %v1612_v19, %v1608_v24  ;;  %v477_v30 = vpop.xlane.xlu0 %476  ;;  %v718_v22 = vsel %vm4445_vm0, %v167_v14, 0.0  ;;  %v697_v24 = vsel %vm4445_vm0, %v160_v16, 0.0 }
 0x125   :  { %v1622_v36 = vrot.slane %v480_v26, %v3203_v23  ;;  %v1617_v37 = vrot.slane %v477_v30, %v3215_v31  ;;  %v207_v30 = vld [vmem:[%s4442_s0 + $0x618] sm:$0xff] }
 0x126   :  { %v838_v38 = vsel %vm4445_vm0, %v207_v30, 0.0 }
 0x127   :  { %v1618_v40 = vsel %vm1291_vm10, %v1617_v37, %v1613_v27  ;;  %767 = vadd.xlane.f32.xlu1 %v766_v32  ;;  %716 = vadd.xlane.f32.xlu0 %v715_v33  ;;  %v184_v32 = vld [vmem:[%s4442_s0 + $0x560] sm:$0xff] }
 0x128   :  { %v486_v42 = vpop.xlane.xlu1 %485  ;;  %v1623_v44 = vsel %vm1298_vm11, %v1622_v36, %v1618_v40  ;;  %v483_v48 = vpop.xlane.xlu0 %482  ;;  %v769_v39 = vsel %vm4445_vm0, %v184_v32, 0.0 }
 0x129   :  { %v1632_v51 = vrot.slane %v486_v42, %v3223_v41  ;;  %v1627_v52 = vrot.slane %v483_v48, %v3229_v45  ;;  %v224_v48 = vld [vmem:[%s4442_s0 + $0x6a0] sm:$0xff] }
 0x12a   :  { %v889_v53 = vsel %vm4445_vm0, %v224_v48, 0.0 }
 0x12b   :  { %v1628_v55 = vsel %vm1305_vm12, %v1627_v52, %v1623_v44  ;;  %887 = vadd.xlane.f32.xlu1 %v886_v49  ;;  %836 = vadd.xlane.f32.xlu0 %v835_v50  ;;  %v231_v44 = vld [vmem:[%s4442_s0 + $0x6d8] sm:$0xff] }
 0x12c   :  { %v492_v58 = vpop.xlane.xlu1 %491  ;;  %v489_v60 = vpop.xlane.xlu0 %488  ;;  %v1633_v0 = vsel %vm1312_vm13, %v1632_v51, %v1628_v55  ;;  %v910_v52 = vsel %vm4445_vm0, %v231_v44, 0.0  ;;  %v112_v55 = vld [vmem:[%s4442_s0 + $0x320] sm:$0xff] }
 0x12d   :  { %v1642_v1 = vrot.slane %v492_v58, %v3243_v59  ;;  %v1637_v2 = vrot.slane %v489_v60, %v3248_v61  ;;  %v105_v58 = vld [vmem:[%s4442_s0 + $0x2e8] sm:$0xff] }
 0x12f   :  { %530 = vadd.xlane.f32.xlu1 %v529_v15  ;;  %908 = vadd.xlane.f32.xlu0 %v907_v62  ;;  %v1638_v4 = vsel %vm1319_vm14, %v1637_v2, %v1633_v0  ;;  %v553_v0 = vsel %vm4445_vm0, %v112_v55, 0.0 }
 0x130   :  { %v498_v5 = vpop.xlane.xlu1 %497  ;;  %v495_v6 = vpop.xlane.xlu0 %494  ;;  %v3660_v10 = vsel %vm1326_vm15, %v1642_v1, %v1638_v4  ;;  %v532_v1 = vsel %vm4445_vm0, %v105_v58, 0.0  ;;  %v161_v4 = vld [vmem:[%s4442_s0 + $0x4a8] sm:$0xff] }
 0x131   :  { %v1651_v11 = vrot.slane %v498_v5, %v3121_v29  ;;  %v1647_v12 = vrot.slane %v495_v6, %v3118_v28  ;;  %v144_v5 = vld [vmem:[%s4442_s0 + $0x420] sm:$0xff] }
 0x132   :  { %v649_v14 = vsel %vm4445_vm0, %v144_v5, 0.0 }
 0x133   :  { %v1652_v19 = vsel %vm1228_vm1, %v1651_v11, %v1647_v12  ;;  %647 = vadd.xlane.f32.xlu1 %v646_v8  ;;  %551 = vadd.xlane.f32.xlu0 %v550_v9  ;;  %v700_v12 = vsel %vm4445_vm0, %v161_v4, 0.0 }
 0x134   :  { %v666_v20 = vpop.xlane.xlu1 %665  ;;  %v663_v21 = vpop.xlane.xlu0 %662 }
 0x135   :  { %v1927_v26 = vrot.slane %v666_v20, %v3121_v29  ;;  %v1923_v27 = vrot.slane %v663_v21, %v3118_v28  ;;  %v185_v20 = vld [vmem:[%s4442_s0 + $0x568] sm:$0xff]  ;;  %v168_v21 = vld [vmem:[%s4442_s0 + $0x4e0] sm:$0xff] }
 0x136   :  { %v721_v30 = vsel %vm4445_vm0, %v168_v21, 0.0 }
 0x137   :  { %v1928_v33 = vsel %vm1228_vm1, %v1927_v26, %v1923_v27  ;;  %719 = vadd.xlane.f32.xlu1 %v718_v22  ;;  %698 = vadd.xlane.f32.xlu0 %v697_v24  ;;  %v772_v27 = vsel %vm4445_vm0, %v185_v20, 0.0 }
 0x138   :  { %v858_v36 = vpop.xlane.xlu1 %857  ;;  %v855_v37 = vpop.xlane.xlu0 %854 }
 0x139   :  { %v2243_v40 = vrot.slane %v858_v36, %v3121_v29  ;;  %v2239_v42 = vrot.slane %v855_v37, %v3118_v28  ;;  %v225_v36 = vld [vmem:[%s4442_s0 + $0x6a8] sm:$0xff]  ;;  %v208_v37 = vld [vmem:[%s4442_s0 + $0x620] sm:$0xff] }
 0x13a   :  { %v892_v44 = vsel %vm4445_vm0, %v225_v36, 0.0  ;;  %v841_v48 = vsel %vm4445_vm0, %v208_v37, 0.0 }
 0x13b   :  { %v2244_v49 = vsel %vm1228_vm1, %v2243_v40, %v2239_v42  ;;  %839 = vadd.xlane.f32.xlu1 %v838_v38  ;;  %770 = vadd.xlane.f32.xlu0 %v769_v39 }
 0x13c   :  { %v615_v50 = vpop.xlane.xlu1 %614  ;;  %v501_v51 = vpop.xlane.xlu0 %500 }
 0x13d   :  { %v1656_v54 = vrot.slane %v501_v51, %v3132_v34  ;;  %v1844_v2 = vrot.slane %v615_v50, %v3118_v28 }
 0x13f   :  { %v1657_v60 = vsel %vm1235_vm2, %v1656_v54, %v1652_v19  ;;  %911 = vadd.xlane.f32.xlu1 %v910_v52  ;;  %890 = vadd.xlane.f32.xlu0 %v889_v53  ;;  %v106_v52 = vld [vmem:[%s4442_s0 + $0x2f0] sm:$0xff] }
 0x140   :  { %v669_v15 = vpop.xlane.xlu1 %668  ;;  %v618_v62 = vpop.xlane.xlu0 %617 }
 0x141   :  { %v1932_v3 = vrot.slane %v669_v15, %v3132_v34  ;;  %v1848_v18 = vrot.slane %v618_v62, %v3121_v29 }
 0x143   :  { %v1933_v6 = vsel %vm1235_vm2, %v1932_v3, %v1928_v33  ;;  %v1849_v8 = vsel %vm1228_vm1, %v1848_v18, %v1844_v2  ;;  %554 = vadd.xlane.f32.xlu1 %v553_v0  ;;  %533 = vadd.xlane.f32.xlu0 %v532_v1  ;;  %v145_v1 = vld [vmem:[%s4442_s0 + $0x428] sm:$0xff] }
 0x144   :  { %v810_v9 = vpop.xlane.xlu1 %809  ;;  %v807_v11 = vpop.xlane.xlu0 %806  ;;  %v113_v2 = vld [vmem:[%s4442_s0 + $0x328] sm:$0xff] }
 0x145   :  { %v2164_v16 = vrot.slane %v810_v9, %v3121_v29  ;;  %v2160_v19 = vrot.slane %v807_v11, %v3118_v28 }
 0x147   :  { %v2165_v22 = vsel %vm1228_vm1, %v2164_v16, %v2160_v19  ;;  %701 = vadd.xlane.f32.xlu1 %v700_v12  ;;  %650 = vadd.xlane.f32.xlu0 %v649_v14  ;;  %v169_v12 = vld [vmem:[%s4442_s0 + $0x4e8] sm:$0xff]  ;;  %v162_v14 = vld [vmem:[%s4442_s0 + $0x4b0] sm:$0xff] }
 0x148   :  { %v504_v24 = vpop.xlane.xlu1 %503  ;;  %v861_v26 = vpop.xlane.xlu0 %860 }
 0x149   :  { %v1661_v32 = vrot.slane %v504_v24, %v3135_v35  ;;  %v2248_v33 = vrot.slane %v861_v26, %v3132_v34  ;;  %v703_v24 = vsel %vm4445_vm0, %v162_v14, 0.0 }
 0x14b   :  { %v1662_v38 = vsel %vm1242_vm3, %v1661_v32, %v1657_v60  ;;  %v2249_v39 = vsel %vm1235_vm2, %v2248_v33, %v2244_v49  ;;  %773 = vadd.xlane.f32.xlu1 %v772_v27  ;;  %722 = vadd.xlane.f32.xlu0 %v721_v30  ;;  %v232_v49 = vld [vmem:[%s4442_s0 + $0x6e0] sm:$0xff]  ;;  %v535_v60 = vsel %vm4445_vm0, %v106_v52, 0.0  ;;  %v209_v30 = vld [vmem:[%s4442_s0 + $0x628] sm:$0xff]  ;;  %v186_v32 = vld [vmem:[%s4442_s0 + $0x570] sm:$0xff] }
 0x14c   :  { %v672_v40 = vpop.xlane.xlu1 %671  ;;  %v621_v42 = vpop.xlane.xlu0 %620  ;;  %v913_v15 = vsel %vm4445_vm0, %v232_v49, 0.0 }
 0x14d   :  { %v1937_v50 = vrot.slane %v672_v40, %v3135_v35  ;;  %v1853_v51 = vrot.slane %v621_v42, %v3132_v34  ;;  %v775_v40 = vsel %vm4445_vm0, %v186_v32, 0.0 }
 0x14f   :  { %v1938_v53 = vsel %vm1242_vm3, %v1937_v50, %v1933_v6  ;;  %v1854_v54 = vsel %vm1235_vm2, %v1853_v51, %v1849_v8  ;;  %893 = vadd.xlane.f32.xlu1 %v892_v44  ;;  %842 = vadd.xlane.f32.xlu0 %v841_v48  ;;  %v652_v6 = vsel %vm4445_vm0, %v145_v1, 0.0  ;;  %v556_v8 = vsel %vm4445_vm0, %v113_v2, 0.0  ;;  %v233_v48 = vld [vmem:[%s4442_s0 + $0x6e8] sm:$0xff]  ;;  %v226_v50 = vld [vmem:[%s4442_s0 + $0x6b0] sm:$0xff] }
 0x150   :  { %v864_v55 = vpop.xlane.xlu1 %863  ;;  %v813_v58 = vpop.xlane.xlu0 %812 }
 0x151   :  { %v2253_v62 = vrot.slane %v864_v55, %v3135_v35  ;;  %v2169_v0 = vrot.slane %v813_v58, %v3132_v34  ;;  %v895_v55 = vsel %vm4445_vm0, %v226_v50, 0.0 }
 0x153   :  { %v2254_v3 = vsel %vm1242_vm3, %v2253_v62, %v2249_v39  ;;  %v2170_v18 = vsel %vm1235_vm2, %v2169_v0, %v2165_v22  ;;  %536 = vadd.xlane.f32.xlu1 %v535_v60  ;;  %914 = vadd.xlane.f32.xlu0 %v913_v15  ;;  %v724_v22 = vsel %vm4445_vm0, %v169_v12, 0.0  ;;  %v844_v39 = vsel %vm4445_vm0, %v209_v30, 0.0  ;;  %v114_v15 = vld [vmem:[%s4442_s0 + $0x330] sm:$0xff]  ;;  %v107_v62 = vld [vmem:[%s4442_s0 + $0x2f8] sm:$0xff] }
 0x154   :  { %v624_v4 = vpop.xlane.xlu1 %623  ;;  %v507_v5 = vpop.xlane.xlu0 %506 }
 0x155   :  { %v1858_v9 = vrot.slane %v624_v4, %v3135_v35  ;;  %v1666_v11 = vrot.slane %v507_v5, %v3153_v47  ;;  %v538_v4 = vsel %vm4445_vm0, %v107_v62, 0.0 }
 0x157   :  { %v1859_v16 = vsel %vm1242_vm3, %v1858_v9, %v1854_v54  ;;  %v1667_v19 = vsel %vm1249_vm4, %v1666_v11, %v1662_v38  ;;  %653 = vadd.xlane.f32.xlu1 %v652_v6  ;;  %557 = vadd.xlane.f32.xlu0 %v556_v8  ;;  %v916_v54 = vsel %vm4445_vm0, %v233_v48, 0.0  ;;  %v163_v8 = vld [vmem:[%s4442_s0 + $0x4b8] sm:$0xff]  ;;  %v146_v9 = vld [vmem:[%s4442_s0 + $0x430] sm:$0xff] }
 0x158   :  { %v816_v20 = vpop.xlane.xlu1 %815  ;;  %v675_v21 = vpop.xlane.xlu0 %674 }
 0x159   :  { %v2174_v26 = vrot.slane %v816_v20, %v3135_v35  ;;  %v1942_v27 = vrot.slane %v675_v21, %v3153_v47  ;;  %v655_v20 = vsel %vm4445_vm0, %v146_v9, 0.0 }
 0x15b   :  { %v2175_v33 = vsel %vm1242_vm3, %v2174_v26, %v2170_v18  ;;  %v1943_v36 = vsel %vm1249_vm4, %v1942_v27, %v1938_v53  ;;  %725 = vadd.xlane.f32.xlu1 %v724_v22  ;;  %704 = vadd.xlane.f32.xlu0 %v703_v24  ;;  %v559_v18 = vsel %vm4445_vm0, %v114_v15, 0.0  ;;  %v187_v24 = vld [vmem:[%s4442_s0 + $0x578] sm:$0xff]  ;;  %v170_v26 = vld [vmem:[%s4442_s0 + $0x4f0] sm:$0xff] }
 0x15c   :  { %v510_v37 = vpop.xlane.xlu1 %509  ;;  %v867_v38 = vpop.xlane.xlu0 %866 }
 0x15d   :  { %v1671_v42 = vrot.slane %v510_v37, %v3150_v46  ;;  %v2258_v44 = vrot.slane %v867_v38, %v3153_v47  ;;  %v727_v37 = vsel %vm4445_vm0, %v170_v26, 0.0 }
 0x15f   :  { %v1672_v51 = vsel %vm1256_vm5, %v1671_v42, %v1667_v19  ;;  %v2259_v52 = vsel %vm1249_vm4, %v2258_v44, %v2254_v3  ;;  %845 = vadd.xlane.f32.xlu1 %v844_v39  ;;  %776 = vadd.xlane.f32.xlu0 %v775_v40  ;;  %v706_v19 = vsel %vm4445_vm0, %v163_v8, 0.0  ;;  %v227_v40 = vld [vmem:[%s4442_s0 + $0x6b8] sm:$0xff]  ;;  %v210_v42 = vld [vmem:[%s4442_s0 + $0x630] sm:$0xff] }
 0x160   :  { %v678_v49 = vpop.xlane.xlu1 %677  ;;  %v627_v53 = vpop.xlane.xlu0 %626 }
 0x161   :  { %v1947_v58 = vrot.slane %v678_v49, %v3150_v46  ;;  %v1863_v60 = vrot.slane %v627_v53, %v3153_v47  ;;  %v847_v49 = vsel %vm4445_vm0, %v210_v42, 0.0 }
 0x163   :  { %v1948_v0 = vsel %vm1256_vm5, %v1947_v58, %v1943_v36  ;;  %v1864_v1 = vsel %vm1249_vm4, %v1863_v60, %v1859_v16  ;;  %917 = vadd.xlane.f32.xlu1 %v916_v54  ;;  %896 = vadd.xlane.f32.xlu0 %v895_v55  ;;  %v778_v36 = vsel %vm4445_vm0, %v187_v24, 0.0  ;;  %v115_v55 = vld [vmem:[%s4442_s0 + $0x338] sm:$0xff]  ;;  %v234_v58 = vld [vmem:[%s4442_s0 + $0x6f0] sm:$0xff] }
 0x164   :  { %v870_v2 = vpop.xlane.xlu1 %869  ;;  %v819_v3 = vpop.xlane.xlu0 %818 }
 0x165   :  { %v2263_v5 = vrot.slane %v870_v2, %v3150_v46  ;;  %v2179_v6 = vrot.slane %v819_v3, %v3153_v47  ;;  %v919_v2 = vsel %vm4445_vm0, %v234_v58, 0.0 }
 0x167   :  { %v2264_v11 = vsel %vm1256_vm5, %v2263_v5, %v2259_v52  ;;  %v2180_v12 = vsel %vm1249_vm4, %v2179_v6, %v2175_v33  ;;  %560 = vadd.xlane.f32.xlu1 %v559_v18  ;;  %539 = vadd.xlane.f32.xlu0 %v538_v4  ;;  %v898_v52 = vsel %vm4445_vm0, %v227_v40, 0.0  ;;  %v171_v4 = vld [vmem:[%s4442_s0 + $0x4f8] sm:$0xff] }
 0x168   :  { %v630_v14 = vpop.xlane.xlu1 %629  ;;  %v513_v16 = vpop.xlane.xlu0 %512  ;;  %v147_v5 = vld [vmem:[%s4442_s0 + $0x438] sm:$0xff] }
 0x169   :  { %v1868_v21 = vrot.slane %v630_v14, %v3150_v46  ;;  %v1676_v22 = vrot.slane %v513_v16, %v3165_v57  ;;  %v658_v14 = vsel %vm4445_vm0, %v147_v5, 0.0 }
 0x16b   :  { %v1869_v27 = vsel %vm1256_vm5, %v1868_v21, %v1864_v1  ;;  %v1677_v30 = vsel %vm1263_vm6, %v1676_v22, %v1672_v51  ;;  %707 = vadd.xlane.f32.xlu1 %v706_v19  ;;  %656 = vadd.xlane.f32.xlu0 %v655_v20  ;;  %v562_v1 = vsel %vm4445_vm0, %v115_v55, 0.0  ;;  %v211_v20 = vld [vmem:[%s4442_s0 + $0x638] sm:$0xff]  ;;  %v188_v21 = vld [vmem:[%s4442_s0 + $0x580] sm:$0xff] }
 0x16c   :  { %v822_v32 = vpop.xlane.xlu1 %821  ;;  %v681_v33 = vpop.xlane.xlu0 %680 }
 0x16d   :  { %v2184_v38 = vrot.slane %v822_v32, %v3150_v46  ;;  %v1952_v39 = vrot.slane %v681_v33, %v3165_v57  ;;  %v781_v32 = vsel %vm4445_vm0, %v188_v21, 0.0  ;;  %v975_v21 = vld [vmem:[%s4443_s1 + $0x10] sm:$0xff] }
 0x16f   :  { %v2185_v44 = vsel %vm1256_vm5, %v2184_v38, %v2180_v12  ;;  %v1953_v48 = vsel %vm1263_vm6, %v1952_v39, %v1948_v0  ;;  %779 = vadd.xlane.f32.xlu1 %v778_v36  ;;  %728 = vadd.xlane.f32.xlu0 %v727_v37  ;;  %v730_v12 = vsel %vm4445_vm0, %v171_v4, 0.0  ;;  %v116_v37 = vld [vmem:[%s4442_s0 + $0x340] sm:$0xff]  ;;  %v235_v38 = vld [vmem:[%s4442_s0 + $0x6f8] sm:$0xff] }
 0x170   :  { %v516_v50 = vpop.xlane.xlu1 %515  ;;  %v873_v51 = vpop.xlane.xlu0 %872 }
 0x171   :  { %v1681_v53 = vrot.slane %v516_v50, %v3162_v56  ;;  %v2268_v54 = vrot.slane %v873_v51, %v3165_v57  ;;  %v922_v50 = vsel %vm4445_vm0, %v235_v38, 0.0  ;;  %v117_v38 = vld [vmem:[%s4442_s0 + $0x348] sm:$0xff] }
 0x173   :  { %v1682_v60 = vsel %vm1270_vm7, %v1681_v53, %v1677_v30  ;;  %v2269_v15 = vsel %vm1263_vm6, %v2268_v54, %v2264_v11  ;;  %899 = vadd.xlane.f32.xlu1 %v898_v52  ;;  %848 = vadd.xlane.f32.xlu0 %v847_v49  ;;  %v850_v30 = vsel %vm4445_vm0, %v211_v20, 0.0  ;;  %v125_v49 = vld [vmem:[%s4442_s0 + $0x388] sm:$0xff]  ;;  %v124_v53 = vld [vmem:[%s4442_s0 + $0x380] sm:$0xff] }
 0x174   :  { %v684_v62 = vpop.xlane.xlu1 %683  ;;  %v633_v0 = vpop.xlane.xlu0 %632  ;;  %v236_v20 = vld [vmem:[%s4442_s0 + $0x700] sm:$0xff] }
 0x175   :  { %v1957_v3 = vrot.slane %v684_v62, %v3162_v56  ;;  %v1873_v18 = vrot.slane %v633_v0, %v3165_v57  ;;  %v589_v62 = vsel %vm4445_vm0, %v124_v53, 0.0  ;;  %v126_v53 = vld [vmem:[%s4442_s0 + $0x390] sm:$0xff] }
 0x177   :  { %v1958_v6 = vsel %vm1270_vm7, %v1957_v3, %v1953_v48  ;;  %v1874_v8 = vsel %vm1263_vm6, %v1873_v18, %v1869_v27  ;;  %563 = vadd.xlane.f32.xlu1 %v562_v1  ;;  %920 = vadd.xlane.f32.xlu0 %v919_v2  ;;  %v565_v48 = vsel %vm4445_vm0, %v116_v37, 0.0  ;;  %v189_v2 = vld [vmem:[%s4442_s0 + $0x588] sm:$0xff]  ;;  %v172_v3 = vld [vmem:[%s4442_s0 + $0x500] sm:$0xff] }
 0x178   :  { %v876_v9 = vpop.xlane.xlu1 %875  ;;  %v825_v11 = vpop.xlane.xlu0 %824  ;;  %v973_v18 = vld [vmem:[%s4443_s1] sm:$0xff] }
 0x179   :  { %v2273_v16 = vrot.slane %v876_v9, %v3162_v56  ;;  %v2189_v19 = vrot.slane %v825_v11, %v3165_v57  ;;  %v784_v11 = vsel %vm4445_vm0, %v189_v2, 0.0  ;;  %v237_v2 = vld [vmem:[%s4442_s0 + $0x708] sm:$0xff] }
 0x17b   :  { %v2274_v22 = vsel %vm1270_vm7, %v2273_v16, %v2269_v15  ;;  %v2190_v24 = vsel %vm1263_vm6, %v2189_v19, %v2185_v44  ;;  %731 = vadd.xlane.f32.xlu1 %v730_v12  ;;  %659 = vadd.xlane.f32.xlu0 %v658_v14  ;;  %v592_v15 = vsel %vm4445_vm0, %v125_v49, 0.0  ;;  %v733_v12 = vsel %vm4445_vm0, %v172_v3, 0.0  ;;  %v244_v19 = vld [vmem:[%s4442_s0 + $0x740] sm:$0xff]  ;;  %v173_v49 = vld [vmem:[%s4442_s0 + $0x508] sm:$0xff]  ;;  %v190_v3 = vld [vmem:[%s4442_s0 + $0x590] sm:$0xff] }
 0x17c   :  { %v636_v26 = vpop.xlane.xlu1 %635  ;;  %v519_v27 = vpop.xlane.xlu0 %518 }
 0x17d   :  { %v1878_v33 = vrot.slane %v636_v26, %v3162_v56  ;;  %v1686_v36 = vrot.slane %v519_v27, %v3195_v13  ;;  %v2455_v26 = vcombine.high %v975_v21, %v975_v21 }
 0x17f   :  { %v1879_v39 = vsel %vm1270_vm7, %v1878_v33, %v1874_v8  ;;  %v1687_v40 = vsel %vm1277_vm8, %v1686_v36, %v1682_v60  ;;  %851 = vadd.xlane.f32.xlu1 %v850_v30  ;;  %782 = vadd.xlane.f32.xlu0 %v781_v32  ;;  %v949_v32 = vsel %vm4445_vm0, %v244_v19, 0.0  ;;  %v925_v33 = vsel %vm4445_vm0, %v236_v20, 0.0 }
 0x180   :  { %v828_v42 = vpop.xlane.xlu1 %827  ;;  %v687_v44 = vpop.xlane.xlu0 %686  ;;  %2604 = vmatprep.subr.mxu0 %v2455_v26 }
 0x181   :  { %v2194_v51 = vrot.slane %v828_v42, %v3162_v56  ;;  %v1962_v52 = vrot.slane %v687_v44, %v3195_v13  ;;  %2605 = vmatpush1.xpose.msra.mxu0 %v975_v21 }
 0x183   :  { %v2195_v54 = vsel %vm1270_vm7, %v2194_v51, %v2190_v24  ;;  %v1963_v55 = vsel %vm1277_vm8, %v1962_v52, %v1958_v6  ;;  %566 = vadd.xlane.f32.xlu1 %v565_v48  ;;  %923 = vadd.xlane.f32.xlu0 %v922_v50  ;;  %v2453_v6 = vcombine.high %v973_v18, %v973_v18  ;;  %v568_v48 = vsel %vm4445_vm0, %v117_v38, 0.0 }
 0x184   :  { %v522_v58 = vpop.xlane.xlu1 %521  ;;  %v879_v60 = vpop.xlane.xlu0 %878 }
 0x185   :  { %v1691_v0 = vrot.slane %v522_v58, %v3183_v7  ;;  %v2278_v1 = vrot.slane %v879_v60, %v3195_v13  ;;  %2464 = vmatprep.subr.mxu1 %v2453_v6  ;;  %v928_v6 = vsel %vm4445_vm0, %v237_v2, 0.0 }
 0x186   :  { %2465 = vmatpush1.xpose.msra.mxu1 %v973_v18 }
 0x187   :  { %v1692_v4 = vsel %vm1284_vm9, %v1691_v0, %v1687_v40  ;;  %v2279_v5 = vsel %vm1277_vm8, %v2278_v1, %v2274_v22  ;;  %593 = vadd.xlane.f32.xlu1 %v592_v15  ;;  %590 = vadd.xlane.f32.xlu0 %v589_v62  ;;  %v736_v62 = vsel %vm4445_vm0, %v173_v49, 0.0  ;;  %v595_v0 = vsel %vm4445_vm0, %v126_v53, 0.0 }
 0x188   :  { %v690_v8 = vpop.xlane.xlu1 %689  ;;  %v639_v9 = vpop.xlane.xlu0 %638 }
 0x189   :  { %v1967_v14 = vrot.slane %v690_v8, %v3183_v7  ;;  %v1883_v16 = vrot.slane %v639_v9, %v3195_v13  ;;  %v787_v8 = vsel %vm4445_vm0, %v190_v3, 0.0 }
 0x18b   :  { %v1968_v22 = vsel %vm1284_vm9, %v1967_v14, %v1963_v55  ;;  %v1884_v24 = vsel %vm1277_vm8, %v1883_v16, %v1879_v39  ;;  %785 = vadd.xlane.f32.xlu1 %v784_v11  ;;  %734 = vadd.xlane.f32.xlu0 %v733_v12  ;;  %v245_v39 = vld [vmem:[%s4442_s0 + $0x748] sm:$0xff]  ;;  %v118_v14 = vld [vmem:[%s4442_s0 + $0x350] sm:$0xff] }
 0x18c   :  { %v762_v27 = vpop.xlane.xlu1 %761  ;;  %v759_v30 = vpop.xlane.xlu0 %758  ;;  %v952_v50 = vsel %vm4445_vm0, %v245_v39, 0.0  ;;  %v571_v26 = vsel %vm4445_vm0, %v118_v14, 0.0 }
 0x18d   :  { %v2085_v36 = vrot.slane %v762_v27, %v3121_v29  ;;  %v2081_v37 = vrot.slane %v759_v30, %v3118_v28 }
 0x18f   :  { %v2086_v40 = vsel %vm1228_vm1, %v2085_v36, %v2081_v37  ;;  %950 = vadd.xlane.f32.xlu1 %v949_v32  ;;  %926 = vadd.xlane.f32.xlu0 %v925_v33  ;;  %v174_v32 = vld [vmem:[%s4442_s0 + $0x510] sm:$0xff] }
 0x190   :  { %v882_v42 = vpop.xlane.xlu1 %881  ;;  %v831_v44 = vpop.xlane.xlu0 %830  ;;  %v739_v38 = vsel %vm4445_vm0, %v174_v32, 0.0  ;;  %v192_v32 = vld [vmem:[%s4442_s0 + $0x5a0] sm:$0xff] }
 0x191   :  { %v2283_v51 = vrot.slane %v882_v42, %v3183_v7  ;;  %v2199_v52 = vrot.slane %v831_v44, %v3195_v13 }
 0x193   :  { %v2284_v55 = vsel %vm1284_vm9, %v2283_v51, %v2279_v5  ;;  %v2200_v58 = vsel %vm1277_vm8, %v2199_v52, %v2195_v54  ;;  %569 = vadd.xlane.f32.xlu1 %v568_v48  ;;  %953 = vadd.xlane.f32.xlu0 %v952_v50  ;;  %v238_v50 = vld [vmem:[%s4442_s0 + $0x710] sm:$0xff] }
 0x194   :  { %v543_v60 = vpop.xlane.xlu1 %542  ;;  %v525_v15 = vpop.xlane.xlu0 %524 }
 0x195   :  { %v1696_v1 = vrot.slane %v525_v15, %v3215_v31  ;;  %v1726_v9 = vrot.slane %v543_v60, %v3118_v28  ;;  %v931_v60 = vsel %vm4445_vm0, %v238_v50, 0.0  ;;  %v120_v50 = vld [vmem:[%s4442_s0 + $0x360] sm:$0xff] }
 0x197   :  { %v3970_v54 = vsel %vm1291_vm10, %v1696_v1, %v1692_v4  ;;  %737 = vadd.xlane.f32.xlu1 %v736_v62  ;;  %596 = vadd.xlane.f32.xlu0 %v595_v0  ;;  %v246_v4 = vld [vmem:[%s4442_s0 + $0x750] sm:$0xff]  ;;  %v119_v1 = vld [vmem:[%s4442_s0 + $0x358] sm:$0xff] }
 0x198   :  { %v642_v18 = vpop.xlane.xlu1 %641  ;;  %v546_v5 = vpop.xlane.xlu0 %545  ;;  %v955_v27 = vsel %vm4445_vm0, %v246_v4, 0.0 }
 0x199   :  { %v1888_v11 = vrot.slane %v642_v18, %v3183_v7  ;;  %v1730_v12 = vrot.slane %v546_v5, %v3121_v29 }
 0x19b   :  { %v3984_v16 = vsel %vm1284_vm9, %v1888_v11, %v1884_v24  ;;  %v1731_v19 = vsel %vm1228_vm1, %v1730_v12, %v1726_v9  ;;  %929 = vadd.xlane.f32.xlu1 %v928_v6  ;;  %788 = vadd.xlane.f32.xlu0 %v787_v8  ;;  %v127_v24 = vld [vmem:[%s4442_s0 + $0x398] sm:$0xff]  ;;  %v574_v6 = vsel %vm4445_vm0, %v119_v1, 0.0 }
 0x19c   :  { %v711_v20 = vpop.xlane.xlu1 %710  ;;  %v693_v21 = vpop.xlane.xlu0 %692  ;;  %v598_v39 = vsel %vm4445_vm0, %v127_v24, 0.0  ;;  %v175_v12 = vld [vmem:[%s4442_s0 + $0x518] sm:$0xff] }
 0x19d   :  { %v1972_v30 = vrot.slane %v693_v21, %v3215_v31  ;;  %v2002_v42 = vrot.slane %v711_v20, %v3118_v28  ;;  %v742_v20 = vsel %vm4445_vm0, %v175_v12, 0.0  ;;  %v240_v12 = vld [vmem:[%s4442_s0 + $0x720] sm:$0xff] }
 0x19f   :  { %v1973_v33 = vsel %vm1291_vm10, %v1972_v30, %v1968_v22  ;;  %572 = vadd.xlane.f32.xlu1 %v571_v26  ;;  %956 = vadd.xlane.f32.xlu0 %v955_v27  ;;  %v191_v22 = vld [vmem:[%s4442_s0 + $0x598] sm:$0xff] }
 0x1a0   :  { %v765_v36 = vpop.xlane.xlu1 %764  ;;  %v714_v37 = vpop.xlane.xlu0 %713  ;;  %v790_v15 = vsel %vm4445_vm0, %v191_v22, 0.0  ;;  %v239_v30 = vld [vmem:[%s4442_s0 + $0x718] sm:$0xff] }
 0x1a1   :  { %v2090_v44 = vrot.slane %v765_v36, %v3132_v34  ;;  %v2006_v48 = vrot.slane %v714_v37, %v3121_v29 }
 0x1a3   :  { %v2091_v51 = vsel %vm1235_vm2, %v2090_v44, %v2086_v40  ;;  %v2007_v52 = vsel %vm1228_vm1, %v2006_v48, %v2002_v42  ;;  %740 = vadd.xlane.f32.xlu1 %v739_v38  ;;  %599 = vadd.xlane.f32.xlu0 %v598_v39  ;;  %v247_v40 = vld [vmem:[%s4442_s0 + $0x758] sm:$0xff]  ;;  %v934_v39 = vsel %vm4445_vm0, %v239_v30, 0.0  ;;  %v793_v42 = vsel %vm4445_vm0, %v192_v32, 0.0  ;;  %v121_v30 = vld [vmem:[%s4442_s0 + $0x368] sm:$0xff] }
 0x1a4   :  { %v885_v49 = vpop.xlane.xlu1 %884  ;;  %v834_v53 = vpop.xlane.xlu0 %833  ;;  %v958_v8 = vsel %vm4445_vm0, %v247_v40, 0.0 }
 0x1a5   :  { %v2288_v62 = vrot.slane %v885_v49, %v3215_v31  ;;  %v2204_v0 = vrot.slane %v834_v53, %v3183_v7 }
 0x1a7   :  { %v2289_v2 = vsel %vm1291_vm10, %v2288_v62, %v2284_v55  ;;  %v2205_v3 = vsel %vm1284_vm9, %v2204_v0, %v2200_v58  ;;  %932 = vadd.xlane.f32.xlu1 %v931_v60  ;;  %791 = vadd.xlane.f32.xlu0 %v790_v15  ;;  %v128_v55 = vld [vmem:[%s4442_s0 + $0x3a0] sm:$0xff]  ;;  %v577_v60 = vsel %vm4445_vm0, %v120_v50, 0.0  ;;  %v177_v50 = vld [vmem:[%s4442_s0 + $0x528] sm:$0xff] }
 0x1a8   :  { %v906_v18 = vpop.xlane.xlu1 %905  ;;  %v903_v5 = vpop.xlane.xlu0 %902  ;;  %v601_v21 = vsel %vm4445_vm0, %v128_v55, 0.0 }
 0x1a9   :  { %v2322_v9 = vrot.slane %v906_v18, %v3121_v29  ;;  %v2318_v11 = vrot.slane %v903_v5, %v3118_v28 }
 0x1ab   :  { %v2323_v58 = vsel %vm1228_vm1, %v2322_v9, %v2318_v11  ;;  %575 = vadd.xlane.f32.xlu1 %v574_v6  ;;  %959 = vadd.xlane.f32.xlu0 %v958_v8 }
 0x1ac   :  { %v549_v14 = vpop.xlane.xlu1 %548  ;;  %v528_v4 = vpop.xlane.xlu0 %527 }
 0x1ad   :  { %v1735_v26 = vrot.slane %v549_v14, %v3132_v34  ;;  %v1701_v27 = vrot.slane %v528_v4, %v3203_v23 }
 0x1af   :  { %v1736_v24 = vsel %vm1235_vm2, %v1735_v26, %v1731_v19  ;;  %v1702_v36 = vsel %vm1298_vm11, %v1701_v27, %v3970_v54  ;;  %743 = vadd.xlane.f32.xlu1 %v742_v20  ;;  %602 = vadd.xlane.f32.xlu0 %v601_v21  ;;  %v248_v54 = vld [vmem:[%s4442_s0 + $0x760] sm:$0xff]  ;;  %v937_v20 = vsel %vm4445_vm0, %v240_v12, 0.0 }
 0x1b0   :  { %v696_v37 = vpop.xlane.xlu1 %695  ;;  %v645_v38 = vpop.xlane.xlu0 %644  ;;  %v961_v15 = vsel %vm4445_vm0, %v248_v54, 0.0 }
 0x1b1   :  { %v1977_v44 = vrot.slane %v696_v37, %v3203_v23  ;;  %v1893_v48 = vrot.slane %v645_v38, %v3215_v31 }
 0x1b3   :  { %v4057_v19 = vsel %vm1298_vm11, %v1977_v44, %v1973_v33  ;;  %v1894_v22 = vsel %vm1291_vm10, %v1893_v48, %v3984_v16  ;;  %935 = vadd.xlane.f32.xlu1 %v934_v39  ;;  %794 = vadd.xlane.f32.xlu0 %v793_v42  ;;  %v176_v33 = vld [vmem:[%s4442_s0 + $0x520] sm:$0xff]  ;;  %v129_v16 = vld [vmem:[%s4442_s0 + $0x3a8] sm:$0xff]  ;;  %v580_v39 = vsel %vm4445_vm0, %v121_v30, 0.0 }
 0x1b4   :  { %v768_v49 = vpop.xlane.xlu1 %767  ;;  %v717_v53 = vpop.xlane.xlu0 %716  ;;  %v745_v6 = vsel %vm4445_vm0, %v176_v33, 0.0  ;;  %v604_v8 = vsel %vm4445_vm0, %v129_v16, 0.0 }
 0x1b5   :  { %v2095_v62 = vrot.slane %v768_v49, %v3135_v35  ;;  %v2011_v0 = vrot.slane %v717_v53, %v3132_v34 }
 0x1b7   :  { %v2096_v1 = vsel %vm1242_vm3, %v2095_v62, %v2091_v51  ;;  %v2012_v40 = vsel %vm1235_vm2, %v2011_v0, %v2007_v52  ;;  %578 = vadd.xlane.f32.xlu1 %v577_v60  ;;  %962 = vadd.xlane.f32.xlu0 %v961_v15  ;;  %v193_v51 = vld [vmem:[%s4442_s0 + $0x5a8] sm:$0xff]  ;;  %v748_v60 = vsel %vm4445_vm0, %v177_v50, 0.0 }
 0x1b8   :  { %v888_v18 = vpop.xlane.xlu1 %887  ;;  %v837_v5 = vpop.xlane.xlu0 %836  ;;  %v796_v21 = vsel %vm4445_vm0, %v193_v51, 0.0  ;;  %v241_v0 = vld [vmem:[%s4442_s0 + $0x728] sm:$0xff] }
 0x1b9   :  { %v2293_v9 = vrot.slane %v888_v18, %v3203_v23  ;;  %v2209_v11 = vrot.slane %v837_v5, %v3215_v31  ;;  %v940_v18 = vsel %vm4445_vm0, %v241_v0, 0.0 }
 0x1bb   :  { %v4084_v52 = vsel %vm1298_vm11, %v2293_v9, %v2289_v2  ;;  %v2210_v55 = vsel %vm1291_vm10, %v2209_v11, %v2205_v3  ;;  %746 = vadd.xlane.f32.xlu1 %v745_v6  ;;  %605 = vadd.xlane.f32.xlu0 %v604_v8  ;;  %v249_v2 = vld [vmem:[%s4442_s0 + $0x768] sm:$0xff]  ;;  %v122_v9 = vld [vmem:[%s4442_s0 + $0x370] sm:$0xff] }
 0x1bc   :  { %v531_v14 = vpop.xlane.xlu1 %530  ;;  %v909_v4 = vpop.xlane.xlu0 %908  ;;  %v964_v42 = vsel %vm4445_vm0, %v249_v2, 0.0 }
 0x1bd   :  { %v1706_v26 = vrot.slane %v531_v14, %v3229_v45  ;;  %v2327_v27 = vrot.slane %v909_v4, %v3132_v34  ;;  %v583_v4 = vsel %vm4445_vm0, %v122_v9, 0.0 }
 0x1bf   :  { %v4098_v3 = vsel %vm1305_vm12, %v1706_v26, %v1702_v36  ;;  %v2328_v32 = vsel %vm1235_vm2, %v2327_v27, %v2323_v58  ;;  %938 = vadd.xlane.f32.xlu1 %v937_v20  ;;  %797 = vadd.xlane.f32.xlu0 %v796_v21  ;;  %v130_v58 = vld [vmem:[%s4442_s0 + $0x3b0] sm:$0xff] }
 0x1c0   :  { %v648_v37 = vpop.xlane.xlu1 %647  ;;  %v552_v38 = vpop.xlane.xlu0 %551  ;;  %v607_v15 = vsel %vm4445_vm0, %v130_v58, 0.0  ;;  %v178_v26 = vld [vmem:[%s4442_s0 + $0x530] sm:$0xff] }
 0x1c1   :  { %v1898_v44 = vrot.slane %v648_v37, %v3203_v23  ;;  %v1740_v48 = vrot.slane %v552_v38, %v3135_v35  ;;  %v751_v2 = vsel %vm4445_vm0, %v178_v26, 0.0 }
 0x1c3   :  { %v4112_v36 = vsel %vm1298_vm11, %v1898_v44, %v1894_v22  ;;  %v1741_v54 = vsel %vm1242_vm3, %v1740_v48, %v1736_v24  ;;  %581 = vadd.xlane.f32.xlu1 %v580_v39  ;;  %965 = vadd.xlane.f32.xlu0 %v964_v42  ;;  %v194_v22 = vld [vmem:[%s4442_s0 + $0x5b0] sm:$0xff]  ;;  %v195_v42 = vld [vmem:[%s4442_s0 + $0x5b8] sm:$0xff] }
 0x1c4   :  { %v720_v49 = vpop.xlane.xlu1 %719  ;;  %v4115_v53 = vpop.xlane.xlu0 %698  ;;  %v799_v5 = vsel %vm4445_vm0, %v194_v22, 0.0  ;;  %v242_v39 = vld [vmem:[%s4442_s0 + $0x730] sm:$0xff]  ;;  %v802_v58 = vsel %vm4445_vm0, %v195_v42, 0.0 }
 0x1c5   :  { %v2016_v62 = vrot.slane %v720_v49, %v3135_v35  ;;  %v943_v50 = vsel %vm4445_vm0, %v242_v39, 0.0  ;;  %v123_v49 = vld [vmem:[%s4442_s0 + $0x378] sm:$0xff] }
 0x1c7   :  { %v2017_v24 = vsel %vm1242_vm3, %v2016_v62, %v2012_v40  ;;  %749 = vadd.xlane.f32.xlu1 %v748_v60  ;;  %608 = vadd.xlane.f32.xlu0 %v607_v15  ;;  %v250_v40 = vld [vmem:[%s4442_s0 + $0x770] sm:$0xff]  ;;  %v251_v60 = vld [vmem:[%s4442_s0 + $0x778] sm:$0xff]  ;;  %v586_v62 = vsel %vm4445_vm0, %v123_v49, 0.0 }
 0x1c8   :  { %v840_v33 = vpop.xlane.xlu1 %839  ;;  %v771_v16 = vpop.xlane.xlu0 %770  ;;  %v967_v20 = vsel %vm4445_vm0, %v250_v40, 0.0  ;;  %v970_v0 = vsel %vm4445_vm0, %v251_v60, 0.0 }
 0x1c9   :  { %v2214_v6 = vrot.slane %v840_v33, %v3203_v23  ;;  %v2100_v8 = vrot.slane %v771_v16, %v3153_v47  ;;  %v243_v16 = vld [vmem:[%s4442_s0 + $0x738] sm:$0xff] }
 0x1ca   :  { %v946_v40 = vsel %vm4445_vm0, %v243_v16, 0.0 }
 0x1cb   :  { %v4138_v11 = vsel %vm1298_vm11, %v2214_v6, %v2210_v55  ;;  %v2101_v12 = vsel %vm1249_vm4, %v2100_v8, %v2096_v1  ;;  %941 = vadd.xlane.f32.xlu1 %v940_v18  ;;  %800 = vadd.xlane.f32.xlu0 %v799_v5  ;;  %v131_v55 = vld [vmem:[%s4442_s0 + $0x3b8] sm:$0xff] }
 0x1cc   :  { %v912_v51 = vpop.xlane.xlu1 %911  ;;  %v4141_v14 = vpop.xlane.xlu0 %890  ;;  %v610_v37 = vsel %vm4445_vm0, %v131_v55, 0.0  ;;  %v179_v18 = vld [vmem:[%s4442_s0 + $0x538] sm:$0xff] }
 0x1cd   :  { %v2332_v21 = vrot.slane %v912_v51, %v3135_v35  ;;  %v754_v51 = vsel %vm4445_vm0, %v179_v18, 0.0 }
 0x1cf   :  { %v2333_v1 = vsel %vm1242_vm3, %v2332_v21, %v2328_v32  ;;  %584 = vadd.xlane.f32.xlu1 %v583_v4  ;;  %968 = vadd.xlane.f32.xlu0 %v967_v20 }
 0x1d0   :  { %v555_v27 = vpop.xlane.xlu1 %554  ;;  %v4153_v30 = vpop.xlane.xlu0 %533 }
 0x1d1   :  { %v1745_v38 = vrot.slane %v555_v27, %v3153_v47 }
 0x1d3   :  { %v1746_v32 = vsel %vm1249_vm4, %v1745_v38, %v1741_v54  ;;  %752 = vadd.xlane.f32.xlu1 %v751_v2  ;;  %611 = vadd.xlane.f32.xlu0 %v610_v37  ;;  %v4206_v2 = vld [vmem:[%s4443_s1 + $0x8] sm:$0xff]  ;;  %v4211_v37 = vld [vmem:[%s4443_s1 + $0x18] sm:$0xff]  ;;  %s2797_s1 = smov [#allocation2]  }
 0x1d4   :  { %v4165_v44 = vpop.xlane.xlu1 %701  ;;  %v4167_v48 = vpop.xlane.xlu0 %650  ;;  %v2456_v42 = vcombine.high %v4211_v37, %v4211_v37  ;;  %s2753_s20 = sshll.u32 %s2797_s1, 4  ;;  %s2754_s20 = int_to_ptr.vmem [resolvable:$true] %s2753_s20 }
 0x1d5   :  { %s2773_s21 = scalar_lea.vmem %s2754_s20, 32  ;;  %p2778_p1 = scmp.lt.s32.totalorder %s2754_s20, %s2754_s20 }
 0x1d6   :  { %2761 = vmatprep.subr.msk.mxu0 %vm4445_vm0, %v2456_v42  ;;  %vm2433_vm0 = vcmask 1041409   ;;  %p2774_p0 = scmp.ne.s32.totalorder %s2754_s20, %s2773_s21  ;;  %p2779_p2 = scmp.lt.s32.totalorder %s2773_s21, %s2773_s21 }
 0x1d7   :  { %944 = vadd.xlane.f32.xlu1 %v943_v50  ;;  %803 = vadd.xlane.f32.xlu0 %v802_v58 }
 0x1d8   :  { %v774_v54 = vpop.xlane.xlu1 %773  ;;  %v723_v15 = vpop.xlane.xlu0 %722  ;;  %p2780_p3 = por %p2779_p2, %p2778_p1 }
 0x1d9   :  { %v2105_v22 = vrot.slane %v774_v54, %v3150_v46  ;;  %v2021_v33 = vrot.slane %v723_v15, %v3153_v47 }
 0x1da   :  { %p2781_p4 = pnand %p2780_p3, %p2774_p0 }
 0x1db   :  { %v2106_v5 = vsel %vm1256_vm5, %v2105_v22, %v2101_v12  ;;  %v2022_v6 = vsel %vm1249_vm4, %v2021_v33, %v2017_v24  ;;  %587 = vadd.xlane.f32.xlu1 %v586_v62  ;;  %971 = vadd.xlane.f32.xlu0 %v970_v0  ;;  %v1982_v33 = vrot.slane %v4115_v53, %v3229_v45 }
 0x1dc   :  { %v4189_v8 = vpop.xlane.xlu1 %893  ;;  %v4191_v9 = vpop.xlane.xlu0 %842 }
 0x1dd   :  { %v2303_v42 = vrot.slane %v4189_v8, %v3223_v41 }
 0x1df   :  { %947 = vadd.xlane.f32.xlu1 %v946_v40  ;;  %755 = vadd.xlane.f32.xlu0 %v754_v51 }
 0x1e0   :  { %v4195_v4 = vpop.xlane.xlu1 %536  ;;  %v915_v20 = vpop.xlane.xlu0 %914 }
 0x1e1   :  { %v2337_v21 = vrot.slane %v915_v20, %v3153_v47  ;;  %v1983_v20 = vsel %vm1305_vm12, %v1982_v33, %v4057_v19  ;;  %v1711_v19 = vrot.slane %v4153_v30, %v3223_v41 }
 0x1e3   :  { %v2338_v12 = vsel %vm1249_vm4, %v2337_v21, %v2333_v1  ;;  %v2454_v1 = vcombine.high %v4206_v2, %v4206_v2 }
 0x1e4   :  { %v4199_v24 = vpop.xlane.xlu1 %653  ;;  %v558_v26 = vpop.xlane.xlu0 %557 }
 0x1e5   :  { %v1750_v55 = vrot.slane %v558_v26, %v3150_v46  ;;  %2534 = vmatprep.subr.mxu1 %v2454_v1 }
 0x1e7   :  { %v1751_v27 = vsel %vm1256_vm5, %v1750_v55, %v1746_v32 }
 0x1e8   :  { %v726_v38 = vpop.xlane.xlu1 %725  ;;  %v705_v39 = vpop.xlane.xlu0 %704 }
 0x1e9   :  { %v2026_v32 = vrot.slane %v726_v38, %v3150_v46  ;;  %v1992_v51 = vrot.slane %v705_v39, %v3248_v61  ;;  %v2298_v38 = vrot.slane %v4141_v14, %v3229_v45 }
 0x1eb   :  { %v2027_v50 = vsel %vm1256_vm5, %v2026_v32, %v2022_v6  ;;  %v1987_v6 = vrot.slane %v4165_v44, %v3223_v41  ;;  %v2299_v30 = vsel %vm1305_vm12, %v2298_v38, %v4084_v52  ;;  %v1903_v52 = vrot.slane %v4167_v48, %v3229_v45 }
 0x1ec   :  { %v4220_v58 = vpop.xlane.xlu1 %845  ;;  %v777_v49 = vpop.xlane.xlu0 %776  ;;  %v2219_v38 = vrot.slane %v4191_v9, %v3229_v45 }
 0x1ed   :  { %v2110_v60 = vrot.slane %v777_v49, %v3165_v57  ;;  %v1904_v48 = vsel %vm1305_vm12, %v1903_v52, %v4112_v36 }
 0x1ee   :  { %v2220_v9 = vsel %vm1305_vm12, %v2219_v38, %v4138_v11 }
 0x1ef   :  { %v2111_v54 = vsel %vm1263_vm6, %v2110_v60, %v2106_v5  ;;  %v1716_v60 = vrot.slane %v4195_v4, %v3248_v61 }
 0x1f0   :  { %v918_v15 = vpop.xlane.xlu1 %917  ;;  %v897_v62 = vpop.xlane.xlu0 %896 }
 0x1f1   :  { %v2342_v0 = vrot.slane %v918_v15, %v3150_v46  ;;  %v2308_v14 = vrot.slane %v897_v62, %v3248_v61 }
 0x1f3   :  { %v2343_v22 = vsel %vm1256_vm5, %v2342_v0, %v2338_v12  ;;  %v1988_v12 = vsel %vm1312_vm13, %v1987_v6, %v1983_v20  ;;  %v2304_v6 = vsel %vm1312_vm13, %v2303_v42, %v2299_v30 }
 0x1f4   :  { %v561_v16 = vpop.xlane.xlu1 %560  ;;  %v540_v18 = vpop.xlane.xlu0 %539  ;;  %v1993_v55 = vsel %vm1319_vm14, %v1992_v51, %v1988_v12 }
 0x1f5   :  { %v1755_v40 = vrot.slane %v561_v16, %v3165_v57  ;;  %v1721_v15 = vrot.slane %v540_v18, %v3243_v59  ;;  %v1712_v16 = vsel %vm1312_vm13, %v1711_v19, %v4098_v3  ;;  %v2309_v18 = vsel %vm1319_vm14, %v2308_v14, %v2304_v6 }
 0x1f6   :  { %v1717_v62 = vsel %vm1319_vm14, %v1716_v60, %v1712_v16  ;;  %v1908_v3 = vrot.slane %v4199_v24, %v3223_v41 }
 0x1f7   :  { %v1756_v5 = vsel %vm1263_vm6, %v1755_v40, %v1751_v27 }
 0x1f8   :  { %v708_v21 = vpop.xlane.xlu1 %707  ;;  %v657_v26 = vpop.xlane.xlu0 %656  ;;  %v1909_v24 = vsel %vm1312_vm13, %v1908_v3, %v1904_v48 }
 0x1f9   :  { %v1997_v53 = vrot.slane %v708_v21, %v3243_v59 }
 0x1fb   :  { %v1998_v44 = vsel %vm1326_vm15, %v1997_v53, %v1993_v55  ;;  %v1913_v53 = vrot.slane %v657_v26, %v3248_v61 }
 0x1fc   :  { %v780_v39 = vpop.xlane.xlu1 %779  ;;  %v729_v1 = vpop.xlane.xlu0 %728  ;;  %v2435_v27 = vsel %vm2433_vm0, %v1998_v44, %v3369_v63 }
 0x1fd   :  { %v2115_v32 = vrot.slane %v780_v39, %v3162_v56  ;;  %v2031_v49 = vrot.slane %v729_v1, %v3165_v57  ;;  %2528 = vmatprep.mubr.f32.mxu1 %v2435_v27  ;;  %v2224_v27 = vrot.slane %v4220_v58, %v3223_v41 }
 0x1ff   :  { %v2116_v63 = vsel %vm1270_vm7, %v2115_v32, %v2111_v54  ;;  %v2032_v0 = vsel %vm1263_vm6, %v2031_v49, %v2027_v50  ;;  %v1722_v54 = vsel %vm1326_vm15, %v1721_v15, %v1717_v62  ;;  %v2225_v60 = vsel %vm1312_vm13, %v2224_v27, %v2220_v9 }
 0x200   :  { %v900_v8 = vpop.xlane.xlu1 %899  ;;  %v849_v33 = vpop.xlane.xlu0 %848 }
 0x201   :  { %v2313_v4 = vrot.slane %v900_v8, %v3243_v59 }
 0x203   :  { %v2314_v50 = vsel %vm1326_vm15, %v2313_v4, %v2309_v18 }
 0x204   :  { %v564_v40 = vpop.xlane.xlu1 %563  ;;  %v921_v51 = vpop.xlane.xlu0 %920  ;;  %v2439_v20 = vsel %vm2433_vm0, %v2314_v50, %v1722_v54 }
 0x205   :  { %v1760_v21 = vrot.slane %v564_v40, %v3162_v56  ;;  %v2347_v12 = vrot.slane %v921_v51, %v3165_v57  ;;  %2668 = vmatprep.mubr.f32.mxu0 %v2439_v20 }
 0x207   :  { %v1761_v55 = vsel %vm1270_vm7, %v1760_v21, %v1756_v5  ;;  %v2348_v44 = vsel %vm1263_vm6, %v2347_v12, %v2343_v22  ;;  %v1914_v5 = vsel %vm1319_vm14, %v1913_v53, %v1909_v24  ;;  %v2229_v22 = vrot.slane %v849_v33, %v3248_v61 }
 0x208   :  { %v732_v39 = vpop.xlane.xlu1 %731  ;;  %v660_v1 = vpop.xlane.xlu0 %659 }
 0x209   :  { %v2036_v19 = vrot.slane %v732_v39, %v3162_v56  ;;  %v1918_v26 = vrot.slane %v660_v1, %v3243_v59  ;;  %v2230_v30 = vsel %vm1319_vm14, %v2229_v22, %v2225_v60 }
 0x20b   :  { %v2037_v36 = vsel %vm1270_vm7, %v2036_v19, %v2032_v0  ;;  %v1919_v42 = vsel %vm1326_vm15, %v1918_v26, %v1914_v5 }
 0x20c   :  { %v852_v32 = vpop.xlane.xlu1 %851  ;;  %v783_v49 = vpop.xlane.xlu0 %782  ;;  %v2434_v58 = vsel %vm2433_vm0, %v1919_v42, %v3272_v17 }
 0x20d   :  { %v2234_v14 = vrot.slane %v852_v32, %v3243_v59  ;;  %v2120_v15 = vrot.slane %v783_v49, %v3195_v13  ;;  %2529 = vmatmul.mubr.f32.vlgmr.msra.gmra.mrb[0].mxu1 %v2434_v58 }
 0x20e   :  { %2535 = vmatpush1.xpose.msra.mxu1 %v4206_v2 }
 0x20f   :  { %v2121_v0 = vsel %vm1277_vm8, %v2120_v15, %v2116_v63  ;;  %v2235_v11 = vsel %vm1326_vm15, %v2234_v14, %v2230_v30 }
 0x210   :  { %v567_v8 = vpop.xlane.xlu1 %566  ;;  %v924_v33 = vpop.xlane.xlu0 %923  ;;  %v2438_v17 = vsel %vm2433_vm0, %v2235_v11, %v3660_v10 }
 0x211   :  { %v1765_v16 = vrot.slane %v567_v8, %v3195_v13  ;;  %v2352_v6 = vrot.slane %v924_v33, %v3162_v56  ;;  %2669 = vmatmul.mubr.f32.vlgmr.msra.gmra.mrb[0].mxu0 %v2438_v17 }
 0x212   :  { %2675 = vmatpush1.xpose.msra.mxu0 %v4211_v37 }
 0x213   :  { %v1766_v4 = vsel %vm1277_vm8, %v1765_v16, %v1761_v55  ;;  %v2353_v2 = vsel %vm1270_vm7, %v2352_v6, %v2348_v44 }
 0x214   :  { %v594_v62 = vpop.xlane.xlu1 %593  ;;  %v591_v63 = vpop.xlane.xlu0 %590 }
 0x215   :  { %v1809_v18 = vrot.slane %v594_v62, %v3121_v29  ;;  %v1805_v54 = vrot.slane %v591_v63, %v3118_v28 }
 0x217   :  { %v1810_v50 = vsel %vm1228_vm1, %v1809_v18, %v1805_v54 }
 0x218   :  { %v786_v10 = vpop.xlane.xlu1 %785  ;;  %v735_v52 = vpop.xlane.xlu0 %734 }
 0x219   :  { %v2125_v40 = vrot.slane %v786_v10, %v3183_v7  ;;  %v2041_v51 = vrot.slane %v735_v52, %v3195_v13 }
 0x21b   :  { %v2126_v37 = vsel %vm1284_vm9, %v2125_v40, %v2121_v0  ;;  %v2042_v20 = vsel %vm1277_vm8, %v2041_v51, %v2037_v36 }
 0x21c   :  { %v951_v3 = vpop.xlane.xlu1 %950  ;;  %v927_v21 = vpop.xlane.xlu0 %926 }
 0x21d   :  { %v2357_v12 = vrot.slane %v927_v21, %v3195_v13  ;;  %v2397_v48 = vrot.slane %v951_v3, %v3118_v28 }
 0x21f   :  { %v2358_v53 = vsel %vm1277_vm8, %v2357_v12, %v2353_v2 }
 0x220   :  { %v570_v55 = vpop.xlane.xlu1 %569  ;;  %v954_v44 = vpop.xlane.xlu0 %953 }
 0x221   :  { %v1770_v38 = vrot.slane %v570_v55, %v3183_v7  ;;  %v2401_v39 = vrot.slane %v954_v44, %v3121_v29 }
 0x223   :  { %v1771_v1 = vsel %vm1284_vm9, %v1770_v38, %v1766_v4  ;;  %v2402_v24 = vsel %vm1228_vm1, %v2401_v39, %v2397_v48  ;;  %vm4446_vm1 = vcmask 523264  }
 0x224   :  { %v738_v27 = vpop.xlane.xlu1 %737  ;;  %v597_v19 = vpop.xlane.xlu0 %596 }
 0x225   :  { %v2046_v26 = vrot.slane %v738_v27, %v3183_v7  ;;  %v1814_v54 = vrot.slane %v597_v19, %v3132_v34 }
 0x227   :  { %v2047_v13 = vsel %vm1284_vm9, %v2046_v26, %v2042_v20  ;;  %v1815_v12 = vsel %vm1235_vm2, %v1814_v54, %v1810_v50 }
 0x228   :  { %v930_v5 = vpop.xlane.xlu1 %929  ;;  %v789_v22 = vpop.xlane.xlu0 %788 }
 0x229   :  { %v2362_v10 = vrot.slane %v930_v5, %v3183_v7  ;;  %v2130_v52 = vrot.slane %v789_v22, %v3215_v31 }
 0x22b   :  { %v2363_v55 = vsel %vm1284_vm9, %v2362_v10, %v2358_v53  ;;  %v2131_v7 = vsel %vm1291_vm10, %v2130_v52, %v2126_v37 }
 0x22c   :  { %v573_v36 = vpop.xlane.xlu1 %572  ;;  %v957_v42 = vpop.xlane.xlu0 %956 }
 0x22d   :  { %v1775_v40 = vrot.slane %v573_v36, %v3215_v31  ;;  %v2406_v3 = vrot.slane %v957_v42, %v3132_v34 }
 0x22f   :  { %v1776_v34 = vsel %vm1291_vm10, %v1775_v40, %v1771_v1 }
 0x230   :  { %v741_v9 = vpop.xlane.xlu1 %740  ;;  %v600_v28 = vpop.xlane.xlu0 %599 }
 0x231   :  { %v2051_v21 = vrot.slane %v741_v9, %v3215_v31  ;;  %v1819_v44 = vrot.slane %v600_v28, %v3135_v35 }
 0x233   :  { %v2052_v37 = vsel %vm1291_vm10, %v2051_v21, %v2047_v13 }
 0x234   :  { %v933_v32 = vpop.xlane.xlu1 %932  ;;  %v792_v49 = vpop.xlane.xlu0 %791 }
 0x235   :  { %v2367_v48 = vrot.slane %v933_v32, %v3215_v31  ;;  %v2135_v38 = vrot.slane %v792_v49, %v3203_v23  ;;  %v2407_v31 = vsel %vm1235_vm2, %v2406_v3, %v2402_v24  ;;  %vm2745_vm2 = vcmask 25600  }
 0x237   :  { %v2368_v1 = vsel %vm1291_vm10, %v2367_v48, %v2363_v55  ;;  %v2136_v28 = vsel %vm1298_vm11, %v2135_v38, %v2131_v7 }
 0x238   :  { %v576_v58 = vpop.xlane.xlu1 %575  ;;  %v960_v29 = vpop.xlane.xlu0 %959 }
 0x239   :  { %v1780_v39 = vrot.slane %v576_v58, %v3203_v23  ;;  %v2411_v27 = vrot.slane %v960_v29, %v3135_v35  ;;  %v1820_v35 = vsel %vm1242_vm3, %v1819_v44, %v1815_v12 }
 0x23b   :  { %v1781_v32 = vsel %vm1298_vm11, %v1780_v39, %v1776_v34  ;;  %v2412_v24 = vsel %vm1242_vm3, %v2411_v27, %v2407_v31 }
 0x23c   :  { %v744_v60 = vpop.xlane.xlu1 %743  ;;  %v603_v14 = vpop.xlane.xlu0 %602 }
 0x23d   :  { %v2056_v19 = vrot.slane %v744_v60, %v3203_v23  ;;  %v1824_v50 = vrot.slane %v603_v14, %v3153_v47 }
 0x23f   :  { %v1825_v49 = vsel %vm1249_vm4, %v1824_v50, %v1820_v35 }
 0x240   :  { %v936_v15 = vpop.xlane.xlu1 %935  ;;  %v795_v30 = vpop.xlane.xlu0 %794 }
 0x241   :  { %v2140_v53 = vrot.slane %v795_v30, %v3229_v45  ;;  %v2372_v22 = vrot.slane %v936_v15, %v3203_v23  ;;  %v2057_v23 = vsel %vm1298_vm11, %v2056_v19, %v2052_v37 }
 0x243   :  { %v2141_v58 = vsel %vm1305_vm12, %v2140_v53, %v2136_v28  ;;  %v2373_v14 = vsel %vm1298_vm11, %v2372_v22, %v2368_v1 }
 0x244   :  { %v4322_v0 = vpop.xlane.xlu1 %578  ;;  %v963_v11 = vpop.xlane.xlu0 %962 }
 0x245   :  { %v2416_v42 = vrot.slane %v963_v11, %v3153_v47 }
 0x248   :  { %v4324_v8 = vpop.xlane.xlu1 %746  ;;  %v606_v33 = vpop.xlane.xlu0 %605 }
 0x249   :  { %v1829_v13 = vrot.slane %v606_v33, %v3150_v46  ;;  %v1785_v33 = vrot.slane %v4322_v0, %v3229_v45 }
 0x24b   :  { %v1830_v54 = vsel %vm1256_vm5, %v1829_v13, %v1825_v49 }
 0x24c   :  { %v4326_v17 = vpop.xlane.xlu1 %938  ;;  %v798_v16 = vpop.xlane.xlu0 %797 }
 0x24d   :  { %v2145_v36 = vrot.slane %v798_v16, %v3223_v41  ;;  %v2417_v16 = vsel %vm1249_vm4, %v2416_v42, %v2412_v24  ;;  %v2377_v52 = vrot.slane %v4326_v17, %v3229_v45 }
 0x24f   :  { %v2146_v15 = vsel %vm1312_vm13, %v2145_v36, %v2141_v58 }
 0x250   :  { %v4328_v6 = vpop.xlane.xlu1 %581  ;;  %v966_v4 = vpop.xlane.xlu0 %965 }
 0x251   :  { %v2421_v29 = vrot.slane %v966_v4, %v3150_v46  ;;  %v2061_v4 = vrot.slane %v4324_v8, %v3229_v45  ;;  %v1790_v0 = vrot.slane %v4328_v6, %v3223_v41 }
 0x253   :  { %v2422_v40 = vsel %vm1256_vm5, %v2421_v29, %v2417_v16 }
 0x254   :  { %v4330_v2 = vpop.xlane.xlu1 %749  ;;  %v4332_v62 = vpop.xlane.xlu0 %608 }
 0x255   :  { %v1834_v30 = vrot.slane %v4332_v62, %v3165_v57  ;;  %v2066_v8 = vrot.slane %v4330_v2, %v3223_v41  ;;  %v1786_v2 = vsel %vm1305_vm12, %v1785_v33, %v1781_v32 }
 0x258   :  { %v4334_v63 = vpop.xlane.xlu1 %941  ;;  %v801_v18 = vpop.xlane.xlu0 %800 }
 0x259   :  { %v2150_v9 = vrot.slane %v801_v18, %v3248_v61  ;;  %v2382_v12 = vrot.slane %v4334_v63, %v3223_v41  ;;  %v2378_v63 = vsel %vm1305_vm12, %v2377_v52, %v2373_v14 }
 0x25b   :  { %v2151_v18 = vsel %vm1319_vm14, %v2150_v9, %v2146_v15  ;;  %v2383_v27 = vsel %vm1312_vm13, %v2382_v12, %v2378_v63 }
 0x25c   :  { %v4340_v51 = vpop.xlane.xlu1 %584  ;;  %v969_v20 = vpop.xlane.xlu0 %968 }
 0x25d   :  { %v2426_v46 = vrot.slane %v969_v20, %v3165_v57  ;;  %v1835_v20 = vsel %vm1263_vm6, %v1834_v30, %v1830_v54  ;;  %v1795_v17 = vrot.slane %v4340_v51, %v3248_v61  ;;  %v1791_v51 = vsel %vm1312_vm13, %v1790_v0, %v1786_v2 }
 0x25f   :  { %v2427_v6 = vsel %vm1263_vm6, %v2426_v46, %v2422_v40  ;;  %v1796_v50 = vsel %vm1319_vm14, %v1795_v17, %v1791_v51 }
 0x260   :  { %v4356_v26 = vpop.xlane.xlu1 %752  ;;  %v612_v5 = vpop.xlane.xlu0 %611 }
 0x261   :  { %v1839_v10 = vrot.slane %v612_v5, %v3162_v56  ;;  %v2071_v55 = vrot.slane %v4356_v26, %v3248_v61 }
 0x263   :  { %v1840_v44 = vsel %vm1270_vm7, %v1839_v10, %v1835_v20 }
 0x264   :  { %v945_v60 = vpop.xlane.xlu1 %944  ;;  %v804_v47 = vpop.xlane.xlu0 %803 }
 0x265   :  { %v2155_v11 = vrot.slane %v804_v47, %v3243_v59 }
 0x267   :  { %v2156_v62 = vsel %vm1326_vm15, %v2155_v11, %v2151_v18 }
 0x268   :  { %v588_v3 = vpop.xlane.xlu1 %587  ;;  %v972_v21 = vpop.xlane.xlu0 %971  ;;  %v2437_v57 = vsel %vm2433_vm0, %v2156_v62, %v3563_v25  ;;  %v2387_v25 = vrot.slane %v945_v60, %v3248_v61 }
 0x269   :  { %v2431_v45 = vrot.slane %v972_v21, %v3162_v56  ;;  %2598 = vmatprep.mubr.f32.mxu1 %v2437_v57  ;;  %v1800_v48 = vrot.slane %v588_v3, %v3243_v59  ;;  %v2062_v56 = vsel %vm1305_vm12, %v2061_v4, %v2057_v23 }
 0x26a   :  { %v2067_v61 = vsel %vm1312_vm13, %v2066_v8, %v2062_v56  ;;  %v2388_v26 = vsel %vm1319_vm14, %v2387_v25, %v2383_v27 }
 0x26b   :  { %v2432_v41 = vsel %vm1270_vm7, %v2431_v45, %v2427_v6  ;;  %v2072_v53 = vsel %vm1319_vm14, %v2071_v55, %v2067_v61  ;;  %v1801_v5 = vsel %vm1326_vm15, %v1800_v48, %v1796_v50 }
 0x26c   :  { %v948_v7 = vpop.xlane.xlu1 %947  ;;  %v756_v38 = vpop.xlane.xlu0 %755  ;;  %v2441_v39 = vsel %vm2433_vm0, %v2432_v41, %v1840_v44 }
 0x26d   :  { %v2392_v34 = vrot.slane %v948_v7, %v3243_v59  ;;  %v2076_v19 = vrot.slane %v756_v38, %v3243_v59  ;;  %2762 = vmatprep.mubr.msk.f32.mxu0 %vm4446_vm1, %v2441_v39 }
 0x26f   :  { %v2393_v31 = vsel %vm1326_vm15, %v2392_v34, %v2388_v26  ;;  %v2077_v37 = vsel %vm1326_vm15, %v2076_v19, %v2072_v53 }
 0x270   :  { %v2436_v22 = vsel %vm2433_vm0, %v2077_v37, %v3466_v43  ;;  %v2440_v36 = vsel %vm2433_vm0, %v2393_v31, %v1801_v5 }
 0x271   :  { %2599 = vmatmul.mubr.f32.vlgmr.msra.gmra.mrb[0].mxu1 %v2436_v22  ;;  %2739 = vmatmul.mubr.f32.vlgmr.msra.gmra.mrb[0].mxu0 %v2440_v36 }
 0x344   :  { %v2600_v59 = vpop.f32.mrb[0].mxu1  ;;  %v2740_v35 = vpop.f32.mrb[0].mxu0 }
 0x345   :  { %v2763_v1 = vadd.f32 %v2740_v35, %v2600_v59  ;;  %v2602_v42 = vpop.f32.mrb[1].mxu1  ;;  %v2742_v9 = vpop.f32.mrb[1].mxu0 }
 0x347   :  { %v2744_v28 = vmul.f32 0.015625, %v2763_v1 }
 0x349   :  { %2746 = vst.msk [vmem:[#allocation2] sm:$0x3] %vm2745_vm2, %v2744_v28 }
 0x34a   :  { %2784 = shalt.err (!%p2781_p4)
}
 0x34b   :  { %s2785_s24 = scalar_lea.hbm %s4444_s2, 32 }
 0x34c   :  { %p2786_p5 = scmp.ne.s32.totalorder %s4444_s2, %s2785_s24  ;;  %p2789_p6 = scmp.lt.u32.totalorder %s2785_s24, %s4444_s2 }
 0x34e   :  { %p2791_p7 = pnand %p2789_p6, %p2786_p5 }
 0x350   :  { %2794 = shalt.err (!%p2791_p7)
}
 0x351   :  { %2756 = dma.vmem_to_hbm [thread:$0]  %s2754_s20, 32, %s4444_s2, [#allocation3]  }
 0x352   :  { %2795 = dma.done.wait [#allocation3], 32  }
 0x353   :  { %2796 = vsyncadd [#allocation3], 4294967264 }
 0x354   :  { %2760 = vsyncpa [#allocation3], 1 }

</bundles_post_ra>
